<compile_context>
chip_gen: v6e
topology: v6e:2x2x1
jax: 0.10.0
libtpu: 0.0.40
codegen_flags: <defaults>
</compile_context>

<pallas_src>
import functools
import math

import jax
import jax.numpy as jnp
from jax.experimental import pallas as pl
from jax.experimental.pallas import tpu as pltpu

T = 13     # time length, fixed by the module (ffns_10 / ffns_20 map 13 -> 30)
M30 = 30   # time-mixer width, fixed by the module
HH = 100   # head hidden width, fixed by the module


# -----------------------------------------------------------------------------
# Kernel: 6 row-major 2-D matmuls + ReLU / sigmoid. One grid step = one batch
# tile; all weights are resident in VMEM across grid steps.
# -----------------------------------------------------------------------------
def _mixer_kernel(xw_ref, xpw_ref,
                  w0b_ref, b0_ref,            # branch 2: ffns_0 (block-diag form)
                  m2_ref, bm2_ref,            # branch 2: ffns_01 + fused ffns_20/21
                  wf1b_ref, bf1_ref,          # branch 1: fused ffns_10/11 (block-diag)
                  wh1_ref, wh2_ref, b2a_ref,  # head layer 1 (ffns_12 folded in)
                  w2b_ref, b2b_ref,           # head layer 2
                  out_ref):
    f32 = jnp.float32
    cd = w0b_ref.dtype            # MXU operand dtype (f32, or bf16 on v6e/v7x)

    xw = xw_ref[...]              # [Bt, T*IS]   lanes flattened as (t, f)
    xpw = xpw_ref[...]            # [Bt, IS*T]   lanes flattened as (f, t)

    # ---- branch 2: ffns_0 (ReLU) -> [ffns_01 . ffns_20 . ffns_21] (ReLU) ----
    h0 = jnp.dot(xw, w0b_ref[...], preferred_element_type=f32) + b0_ref[...]
    h0 = jnp.maximum(h0, 0.0)                                    # [Bt, T*2IS]
    o2b = jnp.dot(h0.astype(cd), m2_ref[...],
                  preferred_element_type=f32) + bm2_ref[...]
    o2b = jnp.maximum(o2b, 0.0)                                  # [Bt, IS*30]

    # ---- branch 1: fused ffns_10 + ffns_11 (ReLU); ffns_12 folded into head --
    ob = jnp.dot(xpw, wf1b_ref[...], preferred_element_type=f32) + bf1_ref[...]
    ob = jnp.maximum(ob, 0.0)                                    # [Bt, IS*13]

    # ---- head: cat + flatten replaced by two direct contractions ----
    f1 = (jnp.dot(ob.astype(cd), wh1_ref[...], preferred_element_type=f32)
          + jnp.dot(o2b.astype(cd), wh2_ref[...], preferred_element_type=f32)
          + b2a_ref[...])
    f1 = jnp.maximum(f1, 0.0)                                    # [Bt, 100]
    f2 = jnp.dot(f1.astype(cd), w2b_ref[...],
                 preferred_element_type=f32) + b2b_ref[...]      # [Bt, 1]
    out_ref[...] = jax.nn.sigmoid(f2)


# -----------------------------------------------------------------------------
# Host-side weight preparation (runs once): transpose to [in, out], fuse the
# activation-free Linear pairs, fold ffns_12 + the concat/flatten into the head.
# -----------------------------------------------------------------------------
def prepare_params(p, input_size, compute_dtype=jnp.float32):
    IS = input_size
    f32 = jnp.float32

    with jax.default_matmul_precision("highest"):
        W0, b0 = p['w0'].astype(f32), p['b0'].reshape(-1).astype(f32)
        W01, b01 = p['w01'].astype(f32), p['b01'].reshape(-1).astype(f32)
        W20, b20 = p['w20'].astype(f32), p['b20'].reshape(-1).astype(f32)
        W21, b21 = p['w21'].astype(f32), p['b21'].reshape(-1).astype(f32)
        W10, b10 = p['w10'].astype(f32), p['b10'].reshape(-1).astype(f32)
        W11, b11 = p['w11'].astype(f32), p['b11'].reshape(-1).astype(f32)
        W12, b12 = p['w12'].astype(f32), p['b12'].reshape(-1).astype(f32)
        W2a, b2a = p['w2a'].astype(f32), p['b2a'].reshape(-1).astype(f32)
        W2b, b2b = p['w2b'].astype(f32), p['b2b'].reshape(-1).astype(f32)

        # --- algebraic fusions (no activation between the fused layers) ---
        Wf1 = W11 @ W10                       # [13, 13]
        bf1 = W11 @ b10 + b11                 # [13]
        Wf2 = W21 @ W20                       # [30, 13]
        bf2 = W21 @ b20 + b21                 # [30]
        Sf2 = Wf2.sum(axis=1)                 # [30]

        # ffns_0 as one wide block-diagonal matmul:  [B, T*IS] @ [T*IS, T*2IS]
        W0_blk = jnp.kron(jnp.eye(T, dtype=f32), W0.T)         # [(t,f), (t,h)]
        b0_rep = jnp.tile(b0, T).reshape(1, T * 2 * IS)

        # ffns_01 (feature mix) merged with fused ffns_20/21 (time mix):
        # M2[(t,h),(f,o)] = W01[f,h] * Wf2[o,t]
        M2 = jnp.einsum('fh,ot->thfo', W01, Wf2).reshape(T * 2 * IS, IS * M30)
        bm2 = (b01[:, None] * Sf2[None, :] + bf2[None, :]).reshape(1, IS * M30)

        # fused ffns_10/11 as one block-diagonal matmul: [B, IS*T] @ [IS*T, IS*T]
        Wf1_blk = jnp.kron(jnp.eye(IS, dtype=f32), Wf1.T)
        bf1_rep = jnp.tile(bf1, IS).reshape(1, IS * T)

        # head layer 1: split w2a (concat order: branch-1 half first), fold
        # ffns_12 (W12, b12) into the branch-1 half.
        half1 = W2a[:, :IS * M30].reshape(HH, IS, M30)          # [h, i, o]
        half2 = W2a[:, IS * M30:]                               # [h, (f,o)]
        Wh1 = jnp.einsum('hio,ot->hit', half1, W12).reshape(HH, IS * T).T
        c1 = jnp.einsum('hio,o->h', half1, b12)
        Wh2 = half2.T                                           # [IS*30, 100]
        b2a_eff = (b2a + c1).reshape(1, HH)

        W2b_t = W2b.T                                           # [100, 1]
        b2b_r = b2b.reshape(1, 1)

    cd = compute_dtype
    return dict(
        w0b=W0_blk.astype(cd), b0=b0_rep,
        m2=M2.astype(cd), bm2=bm2,
        wf1b=Wf1_blk.astype(cd), bf1=bf1_rep,
        wh1=Wh1.astype(cd), wh2=Wh2.astype(cd), b2a=b2a_eff,
        w2b=W2b_t.astype(cd), b2b=b2b_r,
    )


# -----------------------------------------------------------------------------
# Wrapper: x permute/reshape once at the XLA boundary, then a batch-gridded
# pallas_call with resident weights.
# -----------------------------------------------------------------------------
@functools.partial(jax.jit, static_argnames=("b_tile",))
def time_combination_mixer_forward(x, fused, *, b_tile=16):
    B, t_dim, IS = x.shape
    cd = fused['w0b'].dtype

    # host-side layout prep (done once, at the kernel boundary)
    xw = x.reshape(B, t_dim * IS)                           # (t, f) flattened
    xpw = jnp.swapaxes(x, 1, 2).reshape(B, IS * t_dim)      # (f, t) flattened

    Bp = ((B + b_tile - 1) // b_tile) * b_tile
    if Bp != B:
        pad = ((0, Bp - B), (0, 0))
        xw = jnp.pad(xw, pad)
        xpw = jnp.pad(xpw, pad)
    xw = xw.astype(cd)
    xpw = xpw.astype(cd)

    names = ('w0b', 'b0', 'm2', 'bm2', 'wf1b', 'bf1',
             'wh1', 'wh2', 'b2a', 'w2b', 'b2b')
    weights = [fused[n] for n in names]

    batch_spec = lambda n_cols: pl.BlockSpec((b_tile, n_cols), lambda i: (i, 0))
    const_spec = lambda a: pl.BlockSpec(a.shape, lambda i: (0, 0))

    out = pl.pallas_call(
        _mixer_kernel,
        out_shape=jax.ShapeDtypeStruct((Bp, 1), jnp.float32),
        grid=(Bp // b_tile,),
        in_specs=[batch_spec(t_dim * IS), batch_spec(IS * t_dim)]
                 + [const_spec(w) for w in weights],
        out_specs=pl.BlockSpec((b_tile, 1), lambda i: (i, 0)),
        compiler_params=pltpu.CompilerParams(
            dimension_semantics=("parallel",)),
    )(xw, xpw, *weights)

    return out.reshape(-1)[:B]   # matches torch.sigmoid(x.flatten()) -> [B]


# -----------------------------------------------------------------------------
# Deterministic parameter init. Weights: kaiming_uniform(fan_in, relu) like the
# module. Biases: the module zeroes them; small random biases are used here to
# also exercise the bias-folding paths (forward semantics are value-agnostic).
# -----------------------------------------------------------------------------
def _kaiming_uniform(key, out_f, in_f):
    bound = math.sqrt(2.0) * math.sqrt(3.0 / in_f)
    return jax.random.uniform(key, (out_f, in_f), jnp.float32, -bound, bound)


def make_params(key, input_size):
    IS = input_size
    shapes = {
        'w0':  (2 * IS, IS),
        'w01': (IS, 2 * IS),
        'w20': (M30, T),
        'w21': (M30, M30),
        'w10': (M30, T),
        'w11': (T, M30),
        'w12': (M30, T),
        'w2a': (HH, IS * M30 * 2),
        'w2b': (1, HH),
    }
    params = {}
    keys = jax.random.split(key, 2 * len(shapes))
    for n, (name, (o, i)) in enumerate(shapes.items()):
        params[name] = _kaiming_uniform(keys[2 * n], o, i)
        bb = 1.0 / math.sqrt(i)
        params['b' + name[1:]] = jax.random.uniform(
            keys[2 * n + 1], (o,), jnp.float32, -bb, bb)
    return params


# -----------------------------------------------------------------------------
# Pure-JAX reference mirroring the PyTorch forward (for correctness checking).
# -----------------------------------------------------------------------------
def reference_forward(x, p):
    def lin(h, w, b, relu):
        y = jnp.einsum('...i,oi->...o', h, w) + b.reshape(-1)
        return jnp.maximum(y, 0.0) if relu else y
    h0 = lin(x, p['w0'], p['b0'], True)
    o2 = lin(h0, p['w01'], p['b01'], False)
    o2 = lin(jnp.swapaxes(o2, 1, 2), p['w20'], p['b20'], False)
    o2 = lin(o2, p['w21'], p['b21'], True)
    xp = jnp.swapaxes(x, 1, 2)
    o1 = lin(xp, p['w10'], p['b10'], False)
    o1 = lin(o1, p['w11'], p['b11'], True)
    o1 = lin(o1, p['w12'], p['b12'], False)
    cat = jnp.concatenate([o1, o2], axis=1)
    flat = cat.reshape(x.shape[0], -1)
    f1 = jnp.maximum(jnp.dot(flat, p['w2a'].T) + p['b2a'].reshape(-1), 0.0)
    f2 = jnp.dot(f1, p['w2b'].T) + p['b2b'].reshape(-1)
    return jax.nn.sigmoid(f2.reshape(-1))


if __name__ == "__main__":
    B = 24            # batch (padded to a multiple of b_tile=16 inside)
    INPUT_SIZE = 16   # feature dim; time dim is fixed at 13 by the module
    key = jax.random.PRNGKey(0)
    kx, kp = jax.random.split(key)

    x = jax.random.normal(kx, (B, T, INPUT_SIZE), jnp.float32)
    params = make_params(kp, INPUT_SIZE)

    with jax.default_matmul_precision("highest"):
        ref = jax.block_until_ready(reference_forward(x, params))

    # f32 MXU operands: tight correctness check.
    fused_f32 = prepare_params(params, INPUT_SIZE, jnp.float32)
    out_f32 = jax.block_until_ready(
        time_combination_mixer_forward(x, fused_f32, b_tile=16))
    assert out_f32.shape == (B,)
    assert jnp.allclose(out_f32, ref, atol=1e-3, rtol=1e-3), (out_f32, ref)

    # bf16 MXU operands with f32 accumulation (v6e/v7x fast path): loose check.
    fused_bf16 = prepare_params(params, INPUT_SIZE, jnp.bfloat16)
    out_bf16 = jax.block_until_ready(
        time_combination_mixer_forward(x, fused_bf16, b_tile=16))
    assert out_bf16.shape == (B,)
    assert jnp.allclose(out_bf16, ref, atol=2e-2, rtol=0.0), (out_bf16, ref)

    print("KERNEL_OK")
</pallas_src>

<mosaic_0001>
module attributes {stable_mosaic.version = 11 : i64} {
  func.func @_mixer_kernel(%arg0: i32, %arg1: memref<16x208xf32, #tpu.memory_space<vmem>>, %arg2: memref<16x208xf32, #tpu.memory_space<vmem>>, %arg3: memref<208x416xf32, #tpu.memory_space<vmem>>, %arg4: memref<1x416xf32, #tpu.memory_space<vmem>>, %arg5: memref<416x480xf32, #tpu.memory_space<vmem>>, %arg6: memref<1x480xf32, #tpu.memory_space<vmem>>, %arg7: memref<208x208xf32, #tpu.memory_space<vmem>>, %arg8: memref<1x208xf32, #tpu.memory_space<vmem>>, %arg9: memref<208x100xf32, #tpu.memory_space<vmem>>, %arg10: memref<480x100xf32, #tpu.memory_space<vmem>>, %arg11: memref<1x100xf32, #tpu.memory_space<vmem>>, %arg12: memref<100x1xf32, #tpu.memory_space<vmem>>, %arg13: memref<1x1xf32, #tpu.memory_space<vmem>>, %arg14: memref<16x1xf32, #tpu.memory_space<vmem>>) attributes {dimension_semantics = [#tpu.dimension_semantics<parallel>], iteration_bounds = array<i64: 2>, scalar_prefetch = 0 : i64, scratch_operands = 0 : i64, tpu.core_type = #tpu.core_type<tc>, window_params = [{transform_indices = @transform_0, window_bounds = array<i64: 16, 208>}, {transform_indices = @transform_1, window_bounds = array<i64: 16, 208>}, {pipeline_mode = #tpu.pipeline_mode<synchronous>, transform_indices = @transform_2, window_bounds = array<i64: 208, 416>}, {pipeline_mode = #tpu.pipeline_mode<synchronous>, transform_indices = @transform_3, window_bounds = array<i64: 1, 416>}, {pipeline_mode = #tpu.pipeline_mode<synchronous>, transform_indices = @transform_4, window_bounds = array<i64: 416, 480>}, {pipeline_mode = #tpu.pipeline_mode<synchronous>, transform_indices = @transform_5, window_bounds = array<i64: 1, 480>}, {pipeline_mode = #tpu.pipeline_mode<synchronous>, transform_indices = @transform_6, window_bounds = array<i64: 208, 208>}, {pipeline_mode = #tpu.pipeline_mode<synchronous>, transform_indices = @transform_7, window_bounds = array<i64: 1, 208>}, {pipeline_mode = #tpu.pipeline_mode<synchronous>, transform_indices = @transform_8, window_bounds = array<i64: 208, 100>}, {pipeline_mode = #tpu.pipeline_mode<synchronous>, transform_indices = @transform_9, window_bounds = array<i64: 480, 100>}, {pipeline_mode = #tpu.pipeline_mode<synchronous>, transform_indices = @transform_10, window_bounds = array<i64: 1, 100>}, {pipeline_mode = #tpu.pipeline_mode<synchronous>, transform_indices = @transform_11, window_bounds = array<i64: 100, 1>}, {pipeline_mode = #tpu.pipeline_mode<synchronous>, transform_indices = @transform_12, window_bounds = array<i64: 1, 1>}, {transform_indices = @transform_13, window_bounds = array<i64: 16, 1>}]} {
    %c0 = arith.constant 0 : index
    %c0_0 = arith.constant 0 : index
    %0 = vector.load %arg1[%c0, %c0_0] : memref<16x208xf32, #tpu.memory_space<vmem>>, vector<16x208xf32>
    %c0_1 = arith.constant 0 : index
    %c0_2 = arith.constant 0 : index
    %1 = vector.load %arg2[%c0_1, %c0_2] : memref<16x208xf32, #tpu.memory_space<vmem>>, vector<16x208xf32>
    %c0_3 = arith.constant 0 : index
    %c0_4 = arith.constant 0 : index
    %2 = vector.load %arg3[%c0_3, %c0_4] : memref<208x416xf32, #tpu.memory_space<vmem>>, vector<208x416xf32>
    %cst = arith.constant dense<0.000000e+00> : vector<16x416xf32>
    %3 = tpu.matmul %0, %2, %cst {dimension_numbers = #tpu.dot_dimension_numbers<[1], [0], [0], [1], [0, 0, 1, 1], [], []>} : vector<16x208xf32>, vector<208x416xf32>, vector<16x416xf32> -> vector<16x416xf32>
    %c0_5 = arith.constant 0 : index
    %c0_6 = arith.constant 0 : index
    %4 = vector.load %arg4[%c0_5, %c0_6] : memref<1x416xf32, #tpu.memory_space<vmem>>, vector<1x416xf32>
    %5 = vector.broadcast %4 : vector<1x416xf32> to vector<16x416xf32>
    %6 = arith.addf %3, %5 : vector<16x416xf32>
    %cst_7 = arith.constant 0.000000e+00 : f32
    %7 = vector.broadcast %cst_7 : f32 to vector<16x416xf32>
    %8 = arith.maximumf %6, %7 : vector<16x416xf32>
    %c0_8 = arith.constant 0 : index
    %c0_9 = arith.constant 0 : index
    %9 = vector.load %arg5[%c0_8, %c0_9] : memref<416x480xf32, #tpu.memory_space<vmem>>, vector<416x480xf32>
    %cst_10 = arith.constant dense<0.000000e+00> : vector<16x480xf32>
    %10 = tpu.matmul %8, %9, %cst_10 {dimension_numbers = #tpu.dot_dimension_numbers<[1], [0], [0], [1], [0, 0, 1, 1], [], []>} : vector<16x416xf32>, vector<416x480xf32>, vector<16x480xf32> -> vector<16x480xf32>
    %c0_11 = arith.constant 0 : index
    %c0_12 = arith.constant 0 : index
    %11 = vector.load %arg6[%c0_11, %c0_12] : memref<1x480xf32, #tpu.memory_space<vmem>>, vector<1x480xf32>
    %12 = vector.broadcast %11 : vector<1x480xf32> to vector<16x480xf32>
    %13 = arith.addf %10, %12 : vector<16x480xf32>
    %cst_13 = arith.constant 0.000000e+00 : f32
    %14 = vector.broadcast %cst_13 : f32 to vector<16x480xf32>
    %15 = arith.maximumf %13, %14 : vector<16x480xf32>
    %c0_14 = arith.constant 0 : index
    %c0_15 = arith.constant 0 : index
    %16 = vector.load %arg7[%c0_14, %c0_15] : memref<208x208xf32, #tpu.memory_space<vmem>>, vector<208x208xf32>
    %cst_16 = arith.constant dense<0.000000e+00> : vector<16x208xf32>
    %17 = tpu.matmul %1, %16, %cst_16 {dimension_numbers = #tpu.dot_dimension_numbers<[1], [0], [0], [1], [0, 0, 1, 1], [], []>} : vector<16x208xf32>, vector<208x208xf32>, vector<16x208xf32> -> vector<16x208xf32>
    %c0_17 = arith.constant 0 : index
    %c0_18 = arith.constant 0 : index
    %18 = vector.load %arg8[%c0_17, %c0_18] : memref<1x208xf32, #tpu.memory_space<vmem>>, vector<1x208xf32>
    %19 = vector.broadcast %18 : vector<1x208xf32> to vector<16x208xf32>
    %20 = arith.addf %17, %19 : vector<16x208xf32>
    %cst_19 = arith.constant 0.000000e+00 : f32
    %21 = vector.broadcast %cst_19 : f32 to vector<16x208xf32>
    %22 = arith.maximumf %20, %21 : vector<16x208xf32>
    %c0_20 = arith.constant 0 : index
    %c0_21 = arith.constant 0 : index
    %23 = vector.load %arg9[%c0_20, %c0_21] : memref<208x100xf32, #tpu.memory_space<vmem>>, vector<208x100xf32>
    %cst_22 = arith.constant dense<0.000000e+00> : vector<16x100xf32>
    %24 = tpu.matmul %22, %23, %cst_22 {dimension_numbers = #tpu.dot_dimension_numbers<[1], [0], [0], [1], [0, 0, 1, 1], [], []>} : vector<16x208xf32>, vector<208x100xf32>, vector<16x100xf32> -> vector<16x100xf32>
    %c0_23 = arith.constant 0 : index
    %c0_24 = arith.constant 0 : index
    %25 = vector.load %arg10[%c0_23, %c0_24] : memref<480x100xf32, #tpu.memory_space<vmem>>, vector<480x100xf32>
    %cst_25 = arith.constant dense<0.000000e+00> : vector<16x100xf32>
    %26 = tpu.matmul %15, %25, %cst_25 {dimension_numbers = #tpu.dot_dimension_numbers<[1], [0], [0], [1], [0, 0, 1, 1], [], []>} : vector<16x480xf32>, vector<480x100xf32>, vector<16x100xf32> -> vector<16x100xf32>
    %27 = arith.addf %24, %26 : vector<16x100xf32>
    %c0_26 = arith.constant 0 : index
    %c0_27 = arith.constant 0 : index
    %28 = vector.load %arg11[%c0_26, %c0_27] : memref<1x100xf32, #tpu.memory_space<vmem>>, vector<1x100xf32>
    %29 = vector.broadcast %28 : vector<1x100xf32> to vector<16x100xf32>
    %30 = arith.addf %27, %29 : vector<16x100xf32>
    %cst_28 = arith.constant 0.000000e+00 : f32
    %31 = vector.broadcast %cst_28 : f32 to vector<16x100xf32>
    %32 = arith.maximumf %30, %31 : vector<16x100xf32>
    %c0_29 = arith.constant 0 : index
    %c0_30 = arith.constant 0 : index
    %33 = vector.load %arg12[%c0_29, %c0_30] : memref<100x1xf32, #tpu.memory_space<vmem>>, vector<100x1xf32>
    %cst_31 = arith.constant dense<0.000000e+00> : vector<16x1xf32>
    %34 = tpu.matmul %32, %33, %cst_31 {dimension_numbers = #tpu.dot_dimension_numbers<[1], [0], [0], [1], [0, 0, 1, 1], [], []>} : vector<16x100xf32>, vector<100x1xf32>, vector<16x1xf32> -> vector<16x1xf32>
    %c0_32 = arith.constant 0 : index
    %c0_33 = arith.constant 0 : index
    %35 = vector.load %arg13[%c0_32, %c0_33] : memref<1x1xf32, #tpu.memory_space<vmem>>, vector<1x1xf32>
    %36 = vector.broadcast %35 : vector<1x1xf32> to vector<16x1xf32>
    %37 = arith.addf %34, %36 : vector<16x1xf32>
    %38 = arith.negf %37 : vector<16x1xf32>
    %39 = math.exp %38 : vector<16x1xf32>
    %cst_34 = arith.constant 1.000000e+00 : f32
    %40 = vector.broadcast %cst_34 : f32 to vector<16x1xf32>
    %41 = arith.addf %40, %39 : vector<16x1xf32>
    %42 = arith.divf %40, %41 : vector<16x1xf32>
    %c0_35 = arith.constant 0 : index
    %c0_36 = arith.constant 0 : index
    %43 = vector.load %arg14[%c0_35, %c0_36] : memref<16x1xf32, #tpu.memory_space<vmem>>, vector<16x1xf32>
    tpu.vector_store %arg14[%c0_35, %c0_36], %42 {strides = array<i32>} : memref<16x1xf32, #tpu.memory_space<vmem>>, vector<16x1xf32>,
    return
  }
  func.func @transform_0(%arg0: i32) -> (i32, i32) {
    %c0_i32 = arith.constant 0 : i32
    %c0_i32_0 = arith.constant 0 : i32
    return %arg0, %c0_i32 : i32, i32
  }
  func.func @transform_1(%arg0: i32) -> (i32, i32) {
    %c0_i32 = arith.constant 0 : i32
    %c0_i32_0 = arith.constant 0 : i32
    return %arg0, %c0_i32 : i32, i32
  }
  func.func @transform_2(%arg0: i32) -> (i32, i32) {
    %c0_i32 = arith.constant 0 : i32
    %c0_i32_0 = arith.constant 0 : i32
    %c0_i32_1 = arith.constant 0 : i32
    return %c0_i32, %c0_i32_0 : i32, i32
  }
  func.func @transform_3(%arg0: i32) -> (i32, i32) {
    %c0_i32 = arith.constant 0 : i32
    %c0_i32_0 = arith.constant 0 : i32
    %c0_i32_1 = arith.constant 0 : i32
    return %c0_i32, %c0_i32_0 : i32, i32
  }
  func.func @transform_4(%arg0: i32) -> (i32, i32) {
    %c0_i32 = arith.constant 0 : i32
    %c0_i32_0 = arith.constant 0 : i32
    %c0_i32_1 = arith.constant 0 : i32
    return %c0_i32, %c0_i32_0 : i32, i32
  }
  func.func @transform_5(%arg0: i32) -> (i32, i32) {
    %c0_i32 = arith.constant 0 : i32
    %c0_i32_0 = arith.constant 0 : i32
    %c0_i32_1 = arith.constant 0 : i32
    return %c0_i32, %c0_i32_0 : i32, i32
  }
  func.func @transform_6(%arg0: i32) -> (i32, i32) {
    %c0_i32 = arith.constant 0 : i32
    %c0_i32_0 = arith.constant 0 : i32
    %c0_i32_1 = arith.constant 0 : i32
    return %c0_i32, %c0_i32_0 : i32, i32
  }
  func.func @transform_7(%arg0: i32) -> (i32, i32) {
    %c0_i32 = arith.constant 0 : i32
    %c0_i32_0 = arith.constant 0 : i32
    %c0_i32_1 = arith.constant 0 : i32
    return %c0_i32, %c0_i32_0 : i32, i32
  }
  func.func @transform_8(%arg0: i32) -> (i32, i32) {
    %c0_i32 = arith.constant 0 : i32
    %c0_i32_0 = arith.constant 0 : i32
    %c0_i32_1 = arith.constant 0 : i32
    return %c0_i32, %c0_i32_0 : i32, i32
  }
  func.func @transform_9(%arg0: i32) -> (i32, i32) {
    %c0_i32 = arith.constant 0 : i32
    %c0_i32_0 = arith.constant 0 : i32
    %c0_i32_1 = arith.constant 0 : i32
    return %c0_i32, %c0_i32_0 : i32, i32
  }
  func.func @transform_10(%arg0: i32) -> (i32, i32) {
    %c0_i32 = arith.constant 0 : i32
    %c0_i32_0 = arith.constant 0 : i32
    %c0_i32_1 = arith.constant 0 : i32
    return %c0_i32, %c0_i32_0 : i32, i32
  }
  func.func @transform_11(%arg0: i32) -> (i32, i32) {
    %c0_i32 = arith.constant 0 : i32
    %c0_i32_0 = arith.constant 0 : i32
    %c0_i32_1 = arith.constant 0 : i32
    return %c0_i32, %c0_i32_0 : i32, i32
  }
  func.func @transform_12(%arg0: i32) -> (i32, i32) {
    %c0_i32 = arith.constant 0 : i32
    %c0_i32_0 = arith.constant 0 : i32
    %c0_i32_1 = arith.constant 0 : i32
    return %c0_i32, %c0_i32_0 : i32, i32
  }
  func.func @transform_13(%arg0: i32) -> (i32, i32) {
    %c0_i32 = arith.constant 0 : i32
    %c0_i32_0 = arith.constant 0 : i32
    return %arg0, %c0_i32 : i32, i32
  }
}

</mosaic_0001>

<bundles_post_ra>
// kernel: time_combination_mixer_forward.1
= control target key start
LH: loop header
LB: loop body
LE: loop exit
PB: predicated region body
PF: predicated region fallthrough
CT: control target
= control target key end

     0   :  { %s3612_s0 = inlined_call_operand.vmem [shape: f32[32,208], index: 0, kind: input, shape index: {}]   ;;  %s3613_s1 = inlined_call_operand.vmem [shape: f32[32,208], index: 1, kind: input, shape index: {}]   ;;  %s3614_s2 = inlined_call_operand.hbm [shape: f32[208,416], index: 2, kind: input, shape index: {}]   ;;  %s3615_s3 = inlined_call_operand.vmem [shape: f32[1,416], index: 3, kind: input, shape index: {}]   ;;  %s3616_s4 = inlined_call_operand.vmem [shape: f32[416,480], index: 4, kind: input, shape index: {}]   ;;  %s3617_s5 = inlined_call_operand.vmem [shape: f32[1,480], index: 5, kind: input, shape index: {}]   ;;  %s3618_s6 = inlined_call_operand.vmem [shape: f32[208,208], index: 6, kind: input, shape index: {}]   ;;  %s3619_s7 = inlined_call_operand.vmem [shape: f32[1,208], index: 7, kind: input, shape index: {}]   ;;  %s3620_s8 = inlined_call_operand.vmem [shape: f32[208,100], index: 8, kind: input, shape index: {}]   ;;  %s3621_s9 = inlined_call_operand.vmem [shape: f32[480,100], index: 9, kind: input, shape index: {}]   ;;  %s3622_s10 = inlined_call_operand.vmem [shape: f32[1,100], index: 10, kind: input, shape index: {}]   ;;  %s3623_s11 = inlined_call_operand.vmem [shape: f32[100,1], index: 11, kind: input, shape index: {}]   ;;  %s3624_s12 = inlined_call_operand.<no memory space> [shape: f32[1,1], index: 12, kind: input, shape index: {}]   ;;  %s3625_s13 = inlined_call_operand.vmem [shape: f32[32,1], index: 13, kind: output, shape index: {}]  }
   0x1   :  { %v18_v0 = vstv %s3624_s12 }
   0x2   :  { %19 = vst [vmem:[#allocation2] sm:$0x1] %v18_v0 }
   0x3   :  { %20 = vsyncpa [#allocation4], 0  ;;  %s2299_s27 = smov 0  }
   0x4 LB: > { %s2032_s28 = sadd.s32 4294967295, %s2220_s27   ;;  %p2034_p0 = scmp.ge.s32.totalorder %s2220_s27, 1  ;;  %s2220_s27 = sphi %s2299_s27, %s26_s27  }
   0x5   : > { %p340_p1 = scmp.lt.s32.totalorder %s2220_s27, 3  ;;  %s2222_s29 = smov [#allocation3]  }
   0x6   : > { %s352_s30 = sshll.u32 %s2222_s29, 4  ;;  %p2313_p3 = scmp.eq.s32.totalorder %s2032_s28, 0  ;;  %s353_s30 = int_to_ptr.vmem [resolvable:$true] %s352_s30 }
   0x7   : > { %p2307_p2 = pnand %p2034_p0, %p340_p1  ;;  %s2195_s15 = scalar_lea.vmem %s353_s30, 13312 }
   0x8   : > { %p2196_p7 = scmp.ne.s32.totalorder %s353_s30, %s2195_s15  ;;  %p2203_p10 = scmp.lt.s32.totalorder %s353_s30, %s353_s30 }
   0x9   : > { %p2158_p4 = pneg %p2307_p2  ;;  %p2204_p11 = scmp.lt.s32.totalorder %s2195_s15, %s2195_s15 }
   0xb   : > { %p2159_p5 = pnand %p2313_p3, %p2158_p4  ;;  %p2205_p12 = por %p2204_p11, %p2203_p10 }
   0xd   : > { %p2186_p6 = pneg %p2159_p5 }
   0xf   : > { %p2198_p8 = pnand %p2196_p7, %p2186_p6 }
  0x11   : > { %p2199_p9 = pneg %p2198_p8 }
  0x13   : > { %p2206_p13 = pnand %p2205_p12, %p2199_p9 }
  0x15   : > { %2209 = shalt.err (!%p2206_p13)
}
  0x16   : > { %s2223_s16 = smov 512   ;;  %s2224_s17 = smov 32  }
  0x17   : > { %2161 = dma.hbm_to_vmem [thread:$0]  (!%p2159_p5), %s3614_s2, 13312, %s353_s30, [#allocation4], %s2223_s16, %s2223_s16, %s2224_s17  }
  0x18   : > { %418 = sbr.rel (%p2307_p2) target bundleno = 1014 (0x3f6), region = 72 }
  0x1d   : > { %2215 = dma.done.wait (%p2313_p3), [#allocation4], 13312  }
  0x1e   : > { %2217 = vsyncadd (%p2313_p3), [#allocation4], 4294953984  ;;  %v558_v1 = vld [vmem:[#allocation3 + $0x1e8] sm:$0xff]  ;;  %v560_v2 = vld [vmem:[#allocation3 + $0x1f8] sm:$0xff]  ;;  %s2332_s20 = sshll.u32 %s2032_s28, 1  ;;  %vm623_vm0 = vcmask 654336  }
  0x1f   : > { %v557_v3 = vld [vmem:[#allocation3 + $0x1e0] sm:$0xff]  ;;  %630 = vmatprep.subr.mxu0 %v558_v1  ;;  %707 = vmatprep.subr.mxu1 %v560_v2  ;;  %v559_v4 = vld [vmem:[#allocation3 + $0x1f0] sm:$0xff]  ;;  %v554_v5 = vld [vmem:[#allocation3 + $0x1c8] sm:$0xff]  ;;  %p470_p0 = scmp.lt.s32.totalorder %s2332_s20, 3  ;;  %vm1022_vm1 = vcmask 261120   ;;  %vm1582_vm2 = vcmask 785408  }
  0x20   : > { %v556_v6 = vld [vmem:[#allocation3 + $0x1d8] sm:$0xff]  ;;  %631 = vmatpush1.msra.mxu0 %v557_v3  ;;  %708 = vmatpush1.msra.mxu1 %v559_v4  ;;  %v553_v7 = vld [vmem:[#allocation3 + $0x1c0] sm:$0xff]  ;;  %v555_v8 = vld [vmem:[#allocation3 + $0x1d0] sm:$0xff]  ;;  %vm1858_vm3 = vcmask 1043456   ;;  %vm1851_vm4 = vcmask 818176   ;;  %vm1949_vm5 = vcmask 7168  }
  0x21   : > { %v550_v9 = vld [vmem:[#allocation3 + $0x1a8] sm:$0xff]  ;;  %632 = vmatprep.subr.mxu0 %v554_v5  ;;  %709 = vmatprep.subr.mxu1 %v556_v6  ;;  %v552_v10 = vld [vmem:[#allocation3 + $0x1b8] sm:$0xff]  ;;  %v549_v11 = vld [vmem:[#allocation3 + $0x1a0] sm:$0xff]  ;;  %s3629_s20 = smov (!%p470_p0, %s2332_s20), 3 }
  0x22   : > { %v551_v12 = vld [vmem:[#allocation3 + $0x1b0] sm:$0xff]  ;;  %633 = vmatpush1.msra.mxu0 %v553_v7  ;;  %710 = vmatpush1.msra.mxu1 %v555_v8  ;;  %v546_v13 = vld [vmem:[#allocation3 + $0x188] sm:$0xff]  ;;  %v548_v14 = vld [vmem:[#allocation3 + $0x198] sm:$0xff]  ;;  %s2070_s21 = sshll.u32 %s3629_s20, 4 }
  0x23   : > { %634 = vmatprep.subr.mxu0 %v550_v9  ;;  %711 = vmatprep.subr.mxu1 %v552_v10  ;;  %v545_v15 = vld [vmem:[#allocation3 + $0x180] sm:$0xff]  ;;  %v547_v16 = vld [vmem:[#allocation3 + $0x190] sm:$0xff]  ;;  %v542_v17 = vld [vmem:[#allocation3 + $0x168] sm:$0xff]  ;;  %s2346_s24 = scalar_lea.vmem %s3612_s0, %s2070_s21  ;;  %s3129_s12 = scalar_lea.vmem %s3613_s1, %s2070_s21 }
  0x24   : > { %635 = vmatpush1.msra.mxu0 %v549_v11  ;;  %712 = vmatpush1.msra.mxu1 %v551_v12  ;;  %v544_v18 = vld [vmem:[#allocation3 + $0x178] sm:$0xff]  ;;  %v541_v19 = vld [vmem:[#allocation3 + $0x160] sm:$0xff]  ;;  %v543_v20 = vld [vmem:[#allocation3 + $0x170] sm:$0xff] }
  0x25   : > { %636 = vmatprep.subr.mxu0 %v546_v13  ;;  %713 = vmatprep.subr.mxu1 %v548_v14  ;;  %v538_v21 = vld [vmem:[#allocation3 + $0x148] sm:$0xff]  ;;  %v540_v22 = vld [vmem:[#allocation3 + $0x158] sm:$0xff]  ;;  %v537_v23 = vld [vmem:[#allocation3 + $0x140] sm:$0xff] }
  0x26   : > { %637 = vmatpush1.msra.mxu0 %v545_v15  ;;  %714 = vmatpush1.msra.mxu1 %v547_v16  ;;  %v539_v24 = vld [vmem:[#allocation3 + $0x150] sm:$0xff]  ;;  %v534_v25 = vld [vmem:[#allocation3 + $0x128] sm:$0xff]  ;;  %v536_v26 = vld [vmem:[#allocation3 + $0x138] sm:$0xff] }
  0x27   : > { %638 = vmatprep.subr.mxu0 %v542_v17  ;;  %715 = vmatprep.subr.mxu1 %v544_v18  ;;  %v533_v27 = vld [vmem:[#allocation3 + $0x120] sm:$0xff]  ;;  %v535_v28 = vld [vmem:[#allocation3 + $0x130] sm:$0xff]  ;;  %v530_v29 = vld [vmem:[#allocation3 + $0x108] sm:$0xff] }
  0x28   : > { %639 = vmatpush1.msra.mxu0 %v541_v19  ;;  %716 = vmatpush1.msra.mxu1 %v543_v20  ;;  %v532_v30 = vld [vmem:[#allocation3 + $0x118] sm:$0xff]  ;;  %v529_v31 = vld [vmem:[#allocation3 + $0x100] sm:$0xff]  ;;  %v531_v32 = vld [vmem:[#allocation3 + $0x110] sm:$0xff] }
  0x29   : > { %640 = vmatprep.subr.mxu0 %v538_v21  ;;  %717 = vmatprep.subr.mxu1 %v540_v22  ;;  %v526_v33 = vld [vmem:[#allocation3 + $0xe8] sm:$0xff]  ;;  %v528_v34 = vld [vmem:[#allocation3 + $0xf8] sm:$0xff]  ;;  %v525_v35 = vld [vmem:[#allocation3 + $0xe0] sm:$0xff] }
  0x2a   : > { %641 = vmatpush1.msra.mxu0 %v537_v23  ;;  %718 = vmatpush1.msra.mxu1 %v539_v24  ;;  %v527_v36 = vld [vmem:[#allocation3 + $0xf0] sm:$0xff]  ;;  %v522_v37 = vld [vmem:[#allocation3 + $0xc8] sm:$0xff]  ;;  %v524_v38 = vld [vmem:[#allocation3 + $0xd8] sm:$0xff] }
  0x2b   : > { %642 = vmatprep.subr.mxu0 %v534_v25  ;;  %719 = vmatprep.subr.mxu1 %v536_v26  ;;  %v521_v39 = vld [vmem:[#allocation3 + $0xc0] sm:$0xff]  ;;  %v523_v40 = vld [vmem:[#allocation3 + $0xd0] sm:$0xff]  ;;  %v518_v41 = vld [vmem:[#allocation3 + $0xa8] sm:$0xff] }
  0x2c   : > { %643 = vmatpush1.msra.mxu0 %v533_v27  ;;  %720 = vmatpush1.msra.mxu1 %v535_v28  ;;  %v520_v42 = vld [vmem:[#allocation3 + $0xb8] sm:$0xff]  ;;  %v517_v43 = vld [vmem:[#allocation3 + $0xa0] sm:$0xff]  ;;  %v519_v44 = vld [vmem:[#allocation3 + $0xb0] sm:$0xff] }
  0x2d   : > { %644 = vmatprep.subr.mxu0 %v530_v29  ;;  %721 = vmatprep.subr.mxu1 %v532_v30  ;;  %v514_v45 = vld [vmem:[#allocation3 + $0x88] sm:$0xff]  ;;  %v516_v46 = vld [vmem:[#allocation3 + $0x98] sm:$0xff]  ;;  %v513_v47 = vld [vmem:[#allocation3 + $0x80] sm:$0xff] }
  0x2e   : > { %645 = vmatpush1.msra.mxu0 %v529_v31  ;;  %722 = vmatpush1.msra.mxu1 %v531_v32  ;;  %v515_v48 = vld [vmem:[#allocation3 + $0x90] sm:$0xff]  ;;  %v510_v49 = vld [vmem:[#allocation3 + $0x68] sm:$0xff]  ;;  %v512_v50 = vld [vmem:[#allocation3 + $0x78] sm:$0xff] }
  0x2f   : > { %646 = vmatprep.subr.mxu0 %v526_v33  ;;  %723 = vmatprep.subr.mxu1 %v528_v34  ;;  %v509_v51 = vld [vmem:[#allocation3 + $0x60] sm:$0xff]  ;;  %v511_v52 = vld [vmem:[#allocation3 + $0x70] sm:$0xff]  ;;  %v506_v53 = vld [vmem:[#allocation3 + $0x48] sm:$0xff] }
  0x30   : > { %647 = vmatpush1.msra.mxu0 %v525_v35  ;;  %724 = vmatpush1.msra.mxu1 %v527_v36  ;;  %v508_v54 = vld [vmem:[#allocation3 + $0x58] sm:$0xff]  ;;  %v505_v55 = vld [vmem:[#allocation3 + $0x40] sm:$0xff]  ;;  %v507_v56 = vld [vmem:[#allocation3 + $0x50] sm:$0xff] }
  0x31   : > { %648 = vmatprep.subr.mxu0 %v522_v37  ;;  %725 = vmatprep.subr.mxu1 %v524_v38  ;;  %v502_v57 = vld [vmem:[#allocation3 + $0x28] sm:$0xff]  ;;  %v504_v58 = vld [vmem:[#allocation3 + $0x38] sm:$0xff]  ;;  %v501_v59 = vld [vmem:[#allocation3 + $0x20] sm:$0xff] }
  0x32   : > { %649 = vmatpush1.msra.mxu0 %v521_v39  ;;  %726 = vmatpush1.msra.mxu1 %v523_v40  ;;  %v503_v60 = vld [vmem:[#allocation3 + $0x30] sm:$0xff]  ;;  %v498_v61 = vld [vmem:[#allocation3 + $0x8] sm:$0xff]  ;;  %v500_v62 = vld [vmem:[#allocation3 + $0x18] sm:$0xff] }
  0x33   : > { %650 = vmatprep.subr.mxu0 %v518_v41  ;;  %727 = vmatprep.subr.mxu1 %v520_v42  ;;  %v497_v63 = vld [vmem:[#allocation3] sm:$0xff]  ;;  %v499_v0 = vld [vmem:[#allocation3 + $0x10] sm:$0xff]  ;;  %v598_v1 = vld [vmem:[#allocation3 + $0x328] sm:$0xff] }
  0x34   : > { %651 = vmatpush1.msra.mxu0 %v517_v43  ;;  %728 = vmatpush1.msra.mxu1 %v519_v44  ;;  %v600_v2 = vld [vmem:[#allocation3 + $0x338] sm:$0xff]  ;;  %v597_v3 = vld [vmem:[#allocation3 + $0x320] sm:$0xff]  ;;  %v599_v4 = vld [vmem:[#allocation3 + $0x330] sm:$0xff] }
  0x35   : > { %652 = vmatprep.subr.mxu0 %v514_v45  ;;  %729 = vmatprep.subr.mxu1 %v516_v46  ;;  %v594_v5 = vld [vmem:[#allocation3 + $0x308] sm:$0xff]  ;;  %v596_v6 = vld [vmem:[#allocation3 + $0x318] sm:$0xff]  ;;  %v593_v7 = vld [vmem:[#allocation3 + $0x300] sm:$0xff] }
  0x36   : > { %653 = vmatpush1.msra.mxu0 %v513_v47  ;;  %730 = vmatpush1.msra.mxu1 %v515_v48  ;;  %v595_v8 = vld [vmem:[#allocation3 + $0x310] sm:$0xff]  ;;  %v590_v9 = vld [vmem:[#allocation3 + $0x2e8] sm:$0xff]  ;;  %v592_v10 = vld [vmem:[#allocation3 + $0x2f8] sm:$0xff] }
  0x37   : > { %654 = vmatprep.subr.mxu0 %v510_v49  ;;  %731 = vmatprep.subr.mxu1 %v512_v50  ;;  %v589_v11 = vld [vmem:[#allocation3 + $0x2e0] sm:$0xff]  ;;  %v591_v12 = vld [vmem:[#allocation3 + $0x2f0] sm:$0xff]  ;;  %v586_v13 = vld [vmem:[#allocation3 + $0x2c8] sm:$0xff] }
  0x38   : > { %655 = vmatpush1.msra.mxu0 %v509_v51  ;;  %732 = vmatpush1.msra.mxu1 %v511_v52  ;;  %v588_v14 = vld [vmem:[#allocation3 + $0x2d8] sm:$0xff]  ;;  %v585_v15 = vld [vmem:[#allocation3 + $0x2c0] sm:$0xff]  ;;  %v587_v16 = vld [vmem:[#allocation3 + $0x2d0] sm:$0xff] }
  0x39   : > { %656 = vmatprep.subr.mxu0 %v506_v53  ;;  %733 = vmatprep.subr.mxu1 %v508_v54  ;;  %v582_v17 = vld [vmem:[#allocation3 + $0x2a8] sm:$0xff]  ;;  %v584_v18 = vld [vmem:[#allocation3 + $0x2b8] sm:$0xff]  ;;  %v581_v19 = vld [vmem:[#allocation3 + $0x2a0] sm:$0xff] }
  0x3a   : > { %657 = vmatpush1.msra.mxu0 %v505_v55  ;;  %734 = vmatpush1.msra.mxu1 %v507_v56  ;;  %v583_v20 = vld [vmem:[#allocation3 + $0x2b0] sm:$0xff]  ;;  %v578_v21 = vld [vmem:[#allocation3 + $0x288] sm:$0xff]  ;;  %v580_v22 = vld [vmem:[#allocation3 + $0x298] sm:$0xff] }
  0x3b   : > { %658 = vmatprep.subr.mxu0 %v502_v57  ;;  %735 = vmatprep.subr.mxu1 %v504_v58  ;;  %v577_v23 = vld [vmem:[#allocation3 + $0x280] sm:$0xff]  ;;  %v579_v24 = vld [vmem:[#allocation3 + $0x290] sm:$0xff]  ;;  %v574_v25 = vld [vmem:[#allocation3 + $0x268] sm:$0xff] }
  0x3c   : > { %659 = vmatpush1.msra.mxu0 %v501_v59  ;;  %736 = vmatpush1.msra.mxu1 %v503_v60  ;;  %v576_v26 = vld [vmem:[#allocation3 + $0x278] sm:$0xff]  ;;  %v573_v27 = vld [vmem:[#allocation3 + $0x260] sm:$0xff]  ;;  %v575_v28 = vld [vmem:[#allocation3 + $0x270] sm:$0xff] }
  0x3d   : > { %660 = vmatprep.subr.mxu0 %v498_v61  ;;  %737 = vmatprep.subr.mxu1 %v500_v62  ;;  %v570_v29 = vld [vmem:[#allocation3 + $0x248] sm:$0xff]  ;;  %v572_v30 = vld [vmem:[#allocation3 + $0x258] sm:$0xff]  ;;  %v569_v31 = vld [vmem:[#allocation3 + $0x240] sm:$0xff] }
  0x3e   : > { %661 = vmatpush1.msra.mxu0 %v497_v63  ;;  %738 = vmatpush1.msra.mxu1 %v499_v0  ;;  %v571_v32 = vld [vmem:[#allocation3 + $0x250] sm:$0xff]  ;;  %v566_v33 = vld [vmem:[#allocation3 + $0x228] sm:$0xff]  ;;  %v568_v34 = vld [vmem:[#allocation3 + $0x238] sm:$0xff] }
  0x3f   : > { %674 = vmatprep.subr.mxu0 %v598_v1  ;;  %751 = vmatprep.subr.mxu1 %v600_v2  ;;  %v565_v35 = vld [vmem:[#allocation3 + $0x220] sm:$0xff]  ;;  %v567_v36 = vld [vmem:[#allocation3 + $0x230] sm:$0xff]  ;;  %v562_v37 = vld [vmem:[#allocation3 + $0x208] sm:$0xff] }
  0x40   : > { %675 = vmatpush2.msra.mxu0 %v597_v3  ;;  %752 = vmatpush2.msra.mxu1 %v599_v4  ;;  %v564_v38 = vld [vmem:[#allocation3 + $0x218] sm:$0xff]  ;;  %v561_v39 = vld [vmem:[#allocation3 + $0x200] sm:$0xff]  ;;  %v563_v41 = vld [vmem:[#allocation3 + $0x210] sm:$0xff] }
  0x41   : > { %676 = vmatprep.subr.mxu0 %v594_v5  ;;  %753 = vmatprep.subr.mxu1 %v596_v6  ;;  %v490_v40 = vld [vmem:[%s2346_s24 + $0x8] sm:$0xff]  ;;  %v489_v42 = vld [vmem:[%s2346_s24] sm:$0xff]  ;;  %v492_v43 = vld [vmem:[%s2346_s24 + $0x18] sm:$0xff] }
  0x42   : > { %677 = vmatpush2.msra.mxu0 %v593_v7  ;;  %754 = vmatpush2.msra.mxu1 %v595_v8  ;;  %v853_v44 = vld [vmem:[%s3616_s4 + $0x1e8] sm:$0xff]  ;;  %v852_v46 = vld [vmem:[%s3616_s4 + $0x1e0] sm:$0xff]  ;;  %v491_v48 = vld [vmem:[%s2346_s24 + $0x10] sm:$0xff] }
  0x43   : > { %678 = vmatprep.subr.mxu0 %v590_v9  ;;  %755 = vmatprep.subr.mxu1 %v592_v10  ;;  %v981_v45 = vld [vmem:[%s3616_s4 + $0x5e8] sm:$0xff]  ;;  %v980_v47 = vld [vmem:[%s3616_s4 + $0x5e0] sm:$0xff] }
  0x44   : > { %679 = vmatpush2.msra.mxu0 %v589_v11  ;;  %756 = vmatpush2.msra.mxu1 %v591_v12  ;;  %v849_v49 = vld [vmem:[%s3616_s4 + $0x1c8] sm:$0xff]  ;;  %v848_v51 = vld [vmem:[%s3616_s4 + $0x1c0] sm:$0xff] }
  0x45   : > { %680 = vmatprep.subr.mxu0 %v586_v13  ;;  %757 = vmatprep.subr.mxu1 %v588_v14  ;;  %v977_v50 = vld [vmem:[%s3616_s4 + $0x5c8] sm:$0xff]  ;;  %v976_v52 = vld [vmem:[%s3616_s4 + $0x5c0] sm:$0xff] }
  0x46   : > { %681 = vmatpush2.msra.mxu0 %v585_v15  ;;  %758 = vmatpush2.msra.mxu1 %v587_v16  ;;  %v845_v53 = vld [vmem:[%s3616_s4 + $0x1a8] sm:$0xff]  ;;  %v844_v55 = vld [vmem:[%s3616_s4 + $0x1a0] sm:$0xff] }
  0x47   : > { %682 = vmatprep.subr.mxu0 %v582_v17  ;;  %759 = vmatprep.subr.mxu1 %v584_v18  ;;  %v973_v54 = vld [vmem:[%s3616_s4 + $0x5a8] sm:$0xff]  ;;  %v972_v56 = vld [vmem:[%s3616_s4 + $0x5a0] sm:$0xff] }
  0x48   : > { %683 = vmatpush2.msra.mxu0 %v581_v19  ;;  %760 = vmatpush2.msra.mxu1 %v583_v20  ;;  %v841_v57 = vld [vmem:[%s3616_s4 + $0x188] sm:$0xff]  ;;  %v840_v59 = vld [vmem:[%s3616_s4 + $0x180] sm:$0xff] }
  0x49   : > { %684 = vmatprep.subr.mxu0 %v578_v21  ;;  %761 = vmatprep.subr.mxu1 %v580_v22  ;;  %v969_v58 = vld [vmem:[%s3616_s4 + $0x588] sm:$0xff]  ;;  %v968_v60 = vld [vmem:[%s3616_s4 + $0x580] sm:$0xff] }
  0x4a   : > { %685 = vmatpush2.msra.mxu0 %v577_v23  ;;  %762 = vmatpush2.msra.mxu1 %v579_v24  ;;  %v837_v61 = vld [vmem:[%s3616_s4 + $0x168] sm:$0xff]  ;;  %v836_v63 = vld [vmem:[%s3616_s4 + $0x160] sm:$0xff] }
  0x4b   : > { %686 = vmatprep.subr.mxu0 %v574_v25  ;;  %763 = vmatprep.subr.mxu1 %v576_v26  ;;  %v965_v62 = vld [vmem:[%s3616_s4 + $0x568] sm:$0xff]  ;;  %v964_v0 = vld [vmem:[%s3616_s4 + $0x560] sm:$0xff] }
  0x4c   : > { %687 = vmatpush2.msra.mxu0 %v573_v27  ;;  %764 = vmatpush2.msra.mxu1 %v575_v28  ;;  %v833_v1 = vld [vmem:[%s3616_s4 + $0x148] sm:$0xff]  ;;  %v832_v3 = vld [vmem:[%s3616_s4 + $0x140] sm:$0xff] }
  0x4d   : > { %688 = vmatprep.subr.mxu0 %v570_v29  ;;  %765 = vmatprep.subr.mxu1 %v572_v30  ;;  %v961_v2 = vld [vmem:[%s3616_s4 + $0x548] sm:$0xff]  ;;  %v960_v4 = vld [vmem:[%s3616_s4 + $0x540] sm:$0xff] }
  0x4e   : > { %689 = vmatpush2.msra.mxu0 %v569_v31  ;;  %766 = vmatpush2.msra.mxu1 %v571_v32  ;;  %v829_v5 = vld [vmem:[%s3616_s4 + $0x128] sm:$0xff]  ;;  %v828_v7 = vld [vmem:[%s3616_s4 + $0x120] sm:$0xff] }
  0x4f   : > { %690 = vmatprep.subr.mxu0 %v566_v33  ;;  %767 = vmatprep.subr.mxu1 %v568_v34  ;;  %v957_v6 = vld [vmem:[%s3616_s4 + $0x528] sm:$0xff]  ;;  %v956_v8 = vld [vmem:[%s3616_s4 + $0x520] sm:$0xff] }
  0x50   : > { %691 = vmatpush2.msra.mxu0 %v565_v35  ;;  %768 = vmatpush2.msra.mxu1 %v567_v36  ;;  %v825_v9 = vld [vmem:[%s3616_s4 + $0x108] sm:$0xff]  ;;  %v824_v11 = vld [vmem:[%s3616_s4 + $0x100] sm:$0xff] }
  0x51   : > { %692 = vmatprep.subr.mxu0 %v562_v37  ;;  %769 = vmatprep.subr.mxu1 %v564_v38  ;;  %v953_v10 = vld [vmem:[%s3616_s4 + $0x508] sm:$0xff]  ;;  %v952_v12 = vld [vmem:[%s3616_s4 + $0x500] sm:$0xff] }
  0x52   : > { %693 = vmatpush2.msra.mxu0 %v561_v39  ;;  %2047 = vmatprep.mubr.msk.f32.mxu0 %vm623_vm0, %v490_v40  ;;  %v821_v13 = vld [vmem:[%s3616_s4 + $0xe8] sm:$0xff]  ;;  %v820_v15 = vld [vmem:[%s3616_s4 + $0xe0] sm:$0xff] }
  0x53   : > { %770 = vmatpush2.msra.mxu1 %v563_v41  ;;  %2049 = vmatprep.mubr.msk.f32.mxu1 %vm623_vm0, %v490_v40  ;;  %v949_v14 = vld [vmem:[%s3616_s4 + $0x4e8] sm:$0xff]  ;;  %v948_v16 = vld [vmem:[%s3616_s4 + $0x4e0] sm:$0xff] }
  0x54   : > { %695 = vmatmul.mubr.f32.vlgmr.msra.gmra.mxu0 %v489_v42  ;;  %772 = vmatmul.mubr.f32.vlgmr.msra.gmra.mxu1 %v489_v42  ;;  %v817_v17 = vld [vmem:[%s3616_s4 + $0xc8] sm:$0xff]  ;;  %v816_v19 = vld [vmem:[%s3616_s4 + $0xc0] sm:$0xff] }
  0x55   : > { %2050 = vmatprep.mubr.msk.f32.mxu1 %vm623_vm0, %v492_v43  ;;  %2048 = vmatprep.mubr.msk.f32.mxu0 %vm623_vm0, %v492_v43  ;;  %v945_v18 = vld [vmem:[%s3616_s4 + $0x4c8] sm:$0xff]  ;;  %v944_v20 = vld [vmem:[%s3616_s4 + $0x4c0] sm:$0xff] }
  0x56   : > { %1029 = vmatprep.subr.mxu0 %v853_v44  ;;  %1106 = vmatprep.subr.mxu1 %v981_v45  ;;  %v813_v21 = vld [vmem:[%s3616_s4 + $0xa8] sm:$0xff]  ;;  %v812_v23 = vld [vmem:[%s3616_s4 + $0xa0] sm:$0xff] }
  0x57   : > { %1030 = vmatpush1.msra.mxu0 %v852_v46  ;;  %1107 = vmatpush1.msra.mxu1 %v980_v47  ;;  %v941_v22 = vld [vmem:[%s3616_s4 + $0x4a8] sm:$0xff]  ;;  %v940_v24 = vld [vmem:[%s3616_s4 + $0x4a0] sm:$0xff] }
  0x58   : > { %778 = vmatmul.mubr.f32.gmra.mxu1 %v491_v48  ;;  %701 = vmatmul.mubr.f32.gmra.mxu0 %v491_v48  ;;  %v809_v25 = vld [vmem:[%s3616_s4 + $0x88] sm:$0xff]  ;;  %v808_v27 = vld [vmem:[%s3616_s4 + $0x80] sm:$0xff] }
  0x59   : > { %1031 = vmatprep.subr.mxu0 %v849_v49  ;;  %1108 = vmatprep.subr.mxu1 %v977_v50  ;;  %v937_v26 = vld [vmem:[%s3616_s4 + $0x488] sm:$0xff]  ;;  %v936_v28 = vld [vmem:[%s3616_s4 + $0x480] sm:$0xff] }
  0x5a   : > { %1032 = vmatpush1.msra.mxu0 %v848_v51  ;;  %1109 = vmatpush1.msra.mxu1 %v976_v52  ;;  %v805_v29 = vld [vmem:[%s3616_s4 + $0x68] sm:$0xff]  ;;  %v804_v31 = vld [vmem:[%s3616_s4 + $0x60] sm:$0xff] }
  0x5b   : > { %1033 = vmatprep.subr.mxu0 %v845_v53  ;;  %1110 = vmatprep.subr.mxu1 %v973_v54  ;;  %v933_v30 = vld [vmem:[%s3616_s4 + $0x468] sm:$0xff]  ;;  %v932_v32 = vld [vmem:[%s3616_s4 + $0x460] sm:$0xff] }
  0x5c   : > { %1034 = vmatpush1.msra.mxu0 %v844_v55  ;;  %1111 = vmatpush1.msra.mxu1 %v972_v56  ;;  %v801_v33 = vld [vmem:[%s3616_s4 + $0x48] sm:$0xff]  ;;  %v800_v35 = vld [vmem:[%s3616_s4 + $0x40] sm:$0xff] }
  0x5d   : > { %1035 = vmatprep.subr.mxu0 %v841_v57  ;;  %1112 = vmatprep.subr.mxu1 %v969_v58  ;;  %v929_v34 = vld [vmem:[%s3616_s4 + $0x448] sm:$0xff]  ;;  %v928_v36 = vld [vmem:[%s3616_s4 + $0x440] sm:$0xff] }
  0x5e   : > { %1036 = vmatpush1.msra.mxu0 %v840_v59  ;;  %1113 = vmatpush1.msra.mxu1 %v968_v60  ;;  %v797_v37 = vld [vmem:[%s3616_s4 + $0x28] sm:$0xff]  ;;  %v796_v39 = vld [vmem:[%s3616_s4 + $0x20] sm:$0xff] }
  0x5f   : > { %1037 = vmatprep.subr.mxu0 %v837_v61  ;;  %1114 = vmatprep.subr.mxu1 %v965_v62  ;;  %v925_v38 = vld [vmem:[%s3616_s4 + $0x428] sm:$0xff]  ;;  %v924_v40 = vld [vmem:[%s3616_s4 + $0x420] sm:$0xff] }
  0x60   : > { %1038 = vmatpush1.msra.mxu0 %v836_v63  ;;  %1115 = vmatpush1.msra.mxu1 %v964_v0  ;;  %v793_v41 = vld [vmem:[%s3616_s4 + $0x8] sm:$0xff]  ;;  %v792_v43 = vld [vmem:[%s3616_s4] sm:$0xff] }
  0x61   : > { %1039 = vmatprep.subr.mxu0 %v833_v1  ;;  %1116 = vmatprep.subr.mxu1 %v961_v2  ;;  %v921_v42 = vld [vmem:[%s3616_s4 + $0x408] sm:$0xff]  ;;  %v920_v44 = vld [vmem:[%s3616_s4 + $0x400] sm:$0xff] }
  0x62   : > { %1040 = vmatpush1.msra.mxu0 %v832_v3  ;;  %1117 = vmatpush1.msra.mxu1 %v960_v4  ;;  %v917_v45 = vld [vmem:[%s3616_s4 + $0x3e8] sm:$0xff]  ;;  %v916_v47 = vld [vmem:[%s3616_s4 + $0x3e0] sm:$0xff] }
  0x63   : > { %1041 = vmatprep.subr.mxu0 %v829_v5  ;;  %1118 = vmatprep.subr.mxu1 %v957_v6  ;;  %v997_v46 = vld [vmem:[%s3616_s4 + $0x668] sm:$0xff]  ;;  %v912_v49 = vld [vmem:[%s3616_s4 + $0x3c0] sm:$0xff] }
  0x64   : > { %1042 = vmatpush1.msra.mxu0 %v828_v7  ;;  %1119 = vmatpush1.msra.mxu1 %v956_v8  ;;  %v913_v48 = vld [vmem:[%s3616_s4 + $0x3c8] sm:$0xff]  ;;  %v908_v51 = vld [vmem:[%s3616_s4 + $0x3a0] sm:$0xff] }
  0x65   : > { %1043 = vmatprep.subr.mxu0 %v825_v9  ;;  %1120 = vmatprep.subr.mxu1 %v953_v10  ;;  %v909_v50 = vld [vmem:[%s3616_s4 + $0x3a8] sm:$0xff]  ;;  %v904_v53 = vld [vmem:[%s3616_s4 + $0x380] sm:$0xff] }
  0x66   : > { %1044 = vmatpush1.msra.mxu0 %v824_v11  ;;  %1121 = vmatpush1.msra.mxu1 %v952_v12  ;;  %v905_v52 = vld [vmem:[%s3616_s4 + $0x388] sm:$0xff]  ;;  %v900_v55 = vld [vmem:[%s3616_s4 + $0x360] sm:$0xff] }
  0x67   : > { %1045 = vmatprep.subr.mxu0 %v821_v13  ;;  %1122 = vmatprep.subr.mxu1 %v949_v14  ;;  %v901_v54 = vld [vmem:[%s3616_s4 + $0x368] sm:$0xff]  ;;  %v896_v57 = vld [vmem:[%s3616_s4 + $0x340] sm:$0xff] }
  0x68   : > { %1046 = vmatpush1.msra.mxu0 %v820_v15  ;;  %1123 = vmatpush1.msra.mxu1 %v948_v16  ;;  %v897_v56 = vld [vmem:[%s3616_s4 + $0x348] sm:$0xff]  ;;  %v892_v59 = vld [vmem:[%s3616_s4 + $0x320] sm:$0xff] }
  0x69   : > { %1047 = vmatprep.subr.mxu0 %v817_v17  ;;  %1124 = vmatprep.subr.mxu1 %v945_v18  ;;  %v893_v58 = vld [vmem:[%s3616_s4 + $0x328] sm:$0xff]  ;;  %v888_v61 = vld [vmem:[%s3616_s4 + $0x300] sm:$0xff] }
  0x6a   : > { %1048 = vmatpush1.msra.mxu0 %v816_v19  ;;  %1125 = vmatpush1.msra.mxu1 %v944_v20  ;;  %v889_v60 = vld [vmem:[%s3616_s4 + $0x308] sm:$0xff]  ;;  %v884_v63 = vld [vmem:[%s3616_s4 + $0x2e0] sm:$0xff] }
  0x6b   : > { %1049 = vmatprep.subr.mxu0 %v813_v21  ;;  %1126 = vmatprep.subr.mxu1 %v941_v22  ;;  %v885_v62 = vld [vmem:[%s3616_s4 + $0x2e8] sm:$0xff]  ;;  %v880_v1 = vld [vmem:[%s3616_s4 + $0x2c0] sm:$0xff]  ;;  %v855_v21 = vld [vmem:[%s3616_s4 + $0x1f8] sm:$0xff] }
  0x6c   : > { %1050 = vmatpush1.msra.mxu0 %v812_v23  ;;  %1127 = vmatpush1.msra.mxu1 %v940_v24  ;;  %v881_v0 = vld [vmem:[%s3616_s4 + $0x2c8] sm:$0xff]  ;;  %v876_v3 = vld [vmem:[%s3616_s4 + $0x2a0] sm:$0xff]  ;;  %v983_v22 = vld [vmem:[%s3616_s4 + $0x5f8] sm:$0xff]  ;;  %v603_v23 = vlaneseq }
  0x6d   : > { %1051 = vmatprep.subr.mxu0 %v809_v25  ;;  %1128 = vmatprep.subr.mxu1 %v937_v26  ;;  %v877_v2 = vld [vmem:[%s3616_s4 + $0x2a8] sm:$0xff]  ;;  %v872_v5 = vld [vmem:[%s3616_s4 + $0x280] sm:$0xff] }
  0x6e   : > { %1052 = vmatpush1.msra.mxu0 %v808_v27  ;;  %1129 = vmatpush1.msra.mxu1 %v936_v28  ;;  %v873_v4 = vld [vmem:[%s3616_s4 + $0x288] sm:$0xff]  ;;  %v868_v7 = vld [vmem:[%s3616_s4 + $0x260] sm:$0xff]  ;;  %v2674_v24 = vshrl.u32 %v603_v23, 7  ;;  %v951_v23 = vld [vmem:[%s3616_s4 + $0x4f8] sm:$0xff] }
  0x6f   : > { %1053 = vmatprep.subr.mxu0 %v805_v29  ;;  %1130 = vmatprep.subr.mxu1 %v933_v30  ;;  %v869_v6 = vld [vmem:[%s3616_s4 + $0x268] sm:$0xff]  ;;  %v996_v8 = vld [vmem:[%s3616_s4 + $0x660] sm:$0xff] }
  0x70   : > { %1054 = vmatpush1.msra.mxu0 %v804_v31  ;;  %1131 = vmatpush1.msra.mxu1 %v932_v32  ;;  %v865_v9 = vld [vmem:[%s3616_s4 + $0x248] sm:$0xff]  ;;  %v864_v11 = vld [vmem:[%s3616_s4 + $0x240] sm:$0xff]  ;;  %v613_v25 = vsub.s32 2, %v2674_v24  ;;  %v2678_v26 = vsub.s32 0, %v2674_v24  ;;  %v2684_v28 = vsub.s32 1, %v2674_v24  ;;  %v617_v29 = vsub.s32 3, %v2674_v24 }
  0x71   : > { %1055 = vmatprep.subr.mxu0 %v801_v33  ;;  %1132 = vmatprep.subr.mxu1 %v929_v34  ;;  %v993_v10 = vld [vmem:[%s3616_s4 + $0x648] sm:$0xff]  ;;  %v992_v12 = vld [vmem:[%s3616_s4 + $0x640] sm:$0xff] }
  0x72   : > { %1056 = vmatpush1.msra.mxu0 %v800_v35  ;;  %1133 = vmatpush1.msra.mxu1 %v928_v36  ;;  %v861_v13 = vld [vmem:[%s3616_s4 + $0x228] sm:$0xff]  ;;  %v860_v15 = vld [vmem:[%s3616_s4 + $0x220] sm:$0xff] }
  0x73   : > { %1057 = vmatprep.subr.mxu0 %v797_v37  ;;  %1134 = vmatprep.subr.mxu1 %v925_v38  ;;  %v989_v14 = vld [vmem:[%s3616_s4 + $0x628] sm:$0xff]  ;;  %v988_v16 = vld [vmem:[%s3616_s4 + $0x620] sm:$0xff] }
  0x74   : > { %1058 = vmatpush1.msra.mxu0 %v796_v39  ;;  %1135 = vmatpush1.msra.mxu1 %v924_v40  ;;  %v857_v17 = vld [vmem:[%s3616_s4 + $0x208] sm:$0xff]  ;;  %v856_v19 = vld [vmem:[%s3616_s4 + $0x200] sm:$0xff] }
  0x75   : > { %1059 = vmatprep.subr.mxu0 %v793_v41  ;;  %1136 = vmatprep.subr.mxu1 %v921_v42  ;;  %v985_v18 = vld [vmem:[%s3616_s4 + $0x608] sm:$0xff]  ;;  %v984_v20 = vld [vmem:[%s3616_s4 + $0x600] sm:$0xff] }
  0x76   : > { %1060 = vmatpush1.msra.mxu0 %v792_v43  ;;  %1137 = vmatpush1.msra.mxu1 %v920_v44  ;;  %v601_v27 = vld [vmem:[%s3615_s3] sm:$0xf] }
  0x77   : > { %1061 = vmatprep.subr.mxu0 %v917_v45  ;;  %1162 = vmatprep.subr.mxu1 %v997_v46  ;;  %v614_v30 = vrot.slane %v601_v27, %v613_v25  ;;  %v2690_v31 = vrot.slane %v601_v27, %v2678_v26  ;;  %v2693_v32 = vrot.slane %v601_v27, %v2684_v28 }
  0x78   : > { %1062 = vmatpush2.msra.mxu0 %v916_v47  ;;  %1163 = vmatpush2.msra.mxu1 %v996_v8  ;;  %v618_v33 = vrot.slane %v601_v27, %v617_v29  ;;  %v963_v8 = vld [vmem:[%s3616_s4 + $0x558] sm:$0xff]  ;;  %v822_v27 = vld [vmem:[%s3616_s4 + $0xf0] sm:$0xff] }
  0x79   : > { %1063 = vmatprep.subr.mxu0 %v913_v48  ;;  %1164 = vmatprep.subr.mxu1 %v993_v10  ;;  %v962_v10 = vld [vmem:[%s3616_s4 + $0x550] sm:$0xff] }
  0x7a   : > { %1064 = vmatpush2.msra.mxu0 %v912_v49  ;;  %1165 = vmatpush2.msra.mxu1 %v992_v12  ;;  %v854_v49 = vld [vmem:[%s3616_s4 + $0x1f0] sm:$0xff] }
  0x7b   : > { %1065 = vmatprep.subr.mxu0 %v909_v50  ;;  %1166 = vmatprep.subr.mxu1 %v989_v14  ;;  %v982_v50 = vld [vmem:[%s3616_s4 + $0x5f0] sm:$0xff] }
  0x7c   : > { %1066 = vmatpush2.msra.mxu0 %v908_v51  ;;  %1167 = vmatpush2.msra.mxu1 %v988_v16  ;;  %v830_v14 = vld [vmem:[%s3616_s4 + $0x130] sm:$0xff]  ;;  %v827_v16 = vld [vmem:[%s3616_s4 + $0x118] sm:$0xff] }
  0x7d   : > { %1067 = vmatprep.subr.mxu0 %v905_v52  ;;  %1168 = vmatprep.subr.mxu1 %v985_v18  ;;  %v851_v52 = vld [vmem:[%s3616_s4 + $0x1d8] sm:$0xff] }
  0x7e   : > { %1068 = vmatpush2.msra.mxu0 %v904_v53  ;;  %1169 = vmatpush2.msra.mxu1 %v984_v20  ;;  %v979_v53 = vld [vmem:[%s3616_s4 + $0x5d8] sm:$0xff]  ;;  %v954_v20 = vld [vmem:[%s3616_s4 + $0x510] sm:$0xff] }
  0x7f   : > { %1069 = vmatprep.subr.mxu0 %v901_v54  ;;  %1183 = vmatprep.subr.mxu1 %v855_v21  ;;  %v850_v54 = vld [vmem:[%s3616_s4 + $0x1d0] sm:$0xff]  ;;  %v823_v21 = vld [vmem:[%s3616_s4 + $0xf8] sm:$0xff] }
  0x80   : > { %1070 = vmatpush2.msra.mxu0 %v900_v55  ;;  %v978_v55 = vld [vmem:[%s3616_s4 + $0x5d0] sm:$0xff] }
  0x81   : > { %1071 = vmatprep.subr.mxu0 %v897_v56 }
  0x82   : > { %1072 = vmatpush2.msra.mxu0 %v896_v57 }
  0x83   : > { %1073 = vmatprep.subr.mxu0 %v893_v58  ;;  %v847_v58 = vld [vmem:[%s3616_s4 + $0x1b8] sm:$0xff] }
  0x84   : > { %1074 = vmatpush2.msra.mxu0 %v892_v59  ;;  %v975_v59 = vld [vmem:[%s3616_s4 + $0x5b8] sm:$0xff] }
  0x85   : > { %1075 = vmatprep.subr.mxu0 %v889_v60  ;;  %v846_v60 = vld [vmem:[%s3616_s4 + $0x1b0] sm:$0xff] }
  0x86   : > { %1076 = vmatpush2.msra.mxu0 %v888_v61  ;;  %v974_v61 = vld [vmem:[%s3616_s4 + $0x5b0] sm:$0xff] }
  0x87   : > { %1077 = vmatprep.subr.mxu0 %v885_v62  ;;  %v843_v62 = vld [vmem:[%s3616_s4 + $0x198] sm:$0xff] }
  0x88   : > { %1078 = vmatpush2.msra.mxu0 %v884_v63  ;;  %v971_v63 = vld [vmem:[%s3616_s4 + $0x598] sm:$0xff] }
  0x89   : > { %1079 = vmatprep.subr.mxu0 %v881_v0  ;;  %v842_v0 = vld [vmem:[%s3616_s4 + $0x190] sm:$0xff] }
  0x8a   : > { %1080 = vmatpush2.msra.mxu0 %v880_v1  ;;  %v970_v1 = vld [vmem:[%s3616_s4 + $0x590] sm:$0xff] }
  0x8b   : > { %1081 = vmatprep.subr.mxu0 %v877_v2  ;;  %v839_v2 = vld [vmem:[%s3616_s4 + $0x178] sm:$0xff] }
  0x8c   : > { %1082 = vmatpush2.msra.mxu0 %v876_v3 }
  0x8d   : > { %1083 = vmatprep.subr.mxu0 %v873_v4  ;;  %v967_v4 = vld [vmem:[%s3616_s4 + $0x578] sm:$0xff] }
  0x8e   : > { %1084 = vmatpush2.msra.mxu0 %v872_v5  ;;  %v838_v5 = vld [vmem:[%s3616_s4 + $0x170] sm:$0xff] }
  0x8f   : > { %1085 = vmatprep.subr.mxu0 %v869_v6  ;;  %v966_v6 = vld [vmem:[%s3616_s4 + $0x570] sm:$0xff] }
  0x90   : > { %1086 = vmatpush2.msra.mxu0 %v868_v7  ;;  %v835_v7 = vld [vmem:[%s3616_s4 + $0x158] sm:$0xff] }
  0x91   : > { %1087 = vmatprep.subr.mxu0 %v865_v9  ;;  %v834_v9 = vld [vmem:[%s3616_s4 + $0x150] sm:$0xff] }
  0x92   : > { %1088 = vmatpush2.msra.mxu0 %v864_v11  ;;  %v831_v11 = vld [vmem:[%s3616_s4 + $0x138] sm:$0xff] }
  0x93   : > { %1089 = vmatprep.subr.mxu0 %v861_v13  ;;  %v959_v13 = vld [vmem:[%s3616_s4 + $0x538] sm:$0xff] }
  0x94   : > { %1090 = vmatpush2.msra.mxu0 %v860_v15  ;;  %v958_v15 = vld [vmem:[%s3616_s4 + $0x530] sm:$0xff] }
  0x95   : > { %1091 = vmatprep.subr.mxu0 %v857_v17  ;;  %v955_v17 = vld [vmem:[%s3616_s4 + $0x518] sm:$0xff] }
  0x96   : > { %1092 = vmatpush2.msra.mxu0 %v856_v19  ;;  %v826_v19 = vld [vmem:[%s3616_s4 + $0x110] sm:$0xff] }
  0x97   : > { %1260 = vmatprep.subr.mxu0 %v983_v22 }
 0x114   : > { %v696_v34 = vpop.f32.mrf.mxu0  ;;  %v773_v35 = vpop.f32.mrf.mxu1 }
 0x115   : > { %v2697_v36 = vadd.f32 %v773_v35, %v614_v30  ;;  %v2700_v37 = vadd.f32 %v696_v34, %v2690_v31  ;;  %v818_v34 = vld [vmem:[%s3616_s4 + $0xd0] sm:$0xff] }
 0x116   : > { %v698_v38 = vpop.f32.mrf.mxu0  ;;  %v775_v39 = vpop.f32.mrf.mxu1  ;;  %v946_v35 = vld [vmem:[%s3616_s4 + $0x4d0] sm:$0xff] }
 0x117   : > { %v699_v40 = vadd.f32 %v698_v38, %v2693_v32  ;;  %v2703_v41 = vadd.f32 %v775_v39, %v618_v33  ;;  %v786_v42 = vmax.f32 %v2697_v36, 0.0  ;;  %v784_v47 = vmax.f32 %v2700_v37, 0.0  ;;  %v815_v39 = vld [vmem:[%s3616_s4 + $0xb8] sm:$0xff]  ;;  %v494_v37 = vld [vmem:[%s3129_s12 + $0x8] sm:$0xff] }
 0x118   : > { %v779_v43 = vpop.f32.mrf.mxu1  ;;  %v702_v3 = vpop.f32.mrf.mxu0  ;;  %v1372_v36 = vld [vmem:[%s3618_s6 + $0xd8] sm:$0xff] }
 0x119   : > { %v785_v44 = vmax.f32 %v699_v40, 0.0  ;;  %v787_v45 = vmax.f32 %v2703_v41, 0.0  ;;  %v2707_v46 = vadd.f32 %v779_v43, %v614_v30  ;;  %v2823_v22 = vadd.f32 %v702_v3, %v2690_v31  ;;  %v950_v30 = vld [vmem:[%s3616_s4 + $0x4f0] sm:$0xff]  ;;  %v819_v31 = vld [vmem:[%s3616_s4 + $0xd8] sm:$0xff] }
 0x11a   : > { %v781_v48 = vpop.f32.mrf.mxu1  ;;  %v704_v12 = vpop.f32.mrf.mxu0  ;;  %v943_v40 = vld [vmem:[%s3616_s4 + $0x4b8] sm:$0xff]  ;;  %v814_v43 = vld [vmem:[%s3616_s4 + $0xb0] sm:$0xff] }
 0x11b   : > { %v2716_v51 = vadd.f32 %v781_v48, %v618_v33  ;;  %1093 = vmatprep.mubr.f32.mxu0 %v785_v44  ;;  %2051 = vmatprep.mubr.msk.f32.mxu1 %vm1022_vm1, %v787_v45  ;;  %v790_v56 = vmax.f32 %v2707_v46, 0.0  ;;  %v2811_v18 = vadd.f32 %v704_v12, %v2693_v32  ;;  %v947_v33 = vld [vmem:[%s3616_s4 + $0x4d8] sm:$0xff]  ;;  %v788_v38 = vmax.f32 %v2823_v22, 0.0  ;;  %v794_v3 = vld [vmem:[%s3616_s4 + $0x10] sm:$0xff]  ;;  %v1345_v46 = vld [vmem:[%s3618_s6] sm:$0xff] }
 0x11c   : > { %1094 = vmatmul.mubr.f32.vlgmr.msra.gmra.mxu0 %v784_v47  ;;  %1171 = vmatmul.mubr.f32.vlgmr.msra.gmra.mxu1 %v786_v42  ;;  %v811_v48 = vld [vmem:[%s3616_s4 + $0x98] sm:$0xff]  ;;  %v994_v12 = vld [vmem:[%s3616_s4 + $0x650] sm:$0xff] }
 0x11d   : > { %v791_v57 = vmax.f32 %v2716_v51, 0.0  ;;  %1184 = vmatpush1.msra.mxu1 %v854_v49  ;;  %1261 = vmatpush1.msra.mxu0 %v982_v50  ;;  %v789_v32 = vmax.f32 %v2811_v18, 0.0  ;;  %v939_v49 = vld [vmem:[%s3616_s4 + $0x498] sm:$0xff]  ;;  %v810_v50 = vld [vmem:[%s3616_s4 + $0x90] sm:$0xff]  ;;  %v1346_v51 = vld [vmem:[%s3618_s6 + $0x8] sm:$0xff] }
 0x11e   : > { %1185 = vmatprep.subr.mxu1 %v851_v52  ;;  %1262 = vmatprep.subr.mxu0 %v979_v53  ;;  %v938_v52 = vld [vmem:[%s3616_s4 + $0x490] sm:$0xff]  ;;  %v807_v53 = vld [vmem:[%s3616_s4 + $0x78] sm:$0xff] }
 0x11f   : > { %1186 = vmatpush1.msra.mxu1 %v850_v54  ;;  %1263 = vmatpush1.msra.mxu0 %v978_v55  ;;  %v935_v54 = vld [vmem:[%s3616_s4 + $0x478] sm:$0xff]  ;;  %v806_v55 = vld [vmem:[%s3616_s4 + $0x70] sm:$0xff] }
 0x120   : > { %2052 = vmatprep.mubr.msk.f32.mxu1 %vm1022_vm1, %v791_v57  ;;  %1187 = vmatprep.subr.mxu1 %v847_v58  ;;  %v934_v58 = vld [vmem:[%s3616_s4 + $0x470] sm:$0xff]  ;;  %v931_v41 = vld [vmem:[%s3616_s4 + $0x458] sm:$0xff] }
 0x121   : > { %1264 = vmatprep.subr.mxu0 %v975_v59  ;;  %1177 = vmatmul.mubr.f32.gmra.mxu1 %v790_v56  ;;  %v803_v59 = vld [vmem:[%s3616_s4 + $0x58] sm:$0xff] }
 0x122   : > { %1188 = vmatpush1.msra.mxu1 %v846_v60  ;;  %1265 = vmatpush1.msra.mxu0 %v974_v61  ;;  %v930_v60 = vld [vmem:[%s3616_s4 + $0x450] sm:$0xff]  ;;  %v799_v61 = vld [vmem:[%s3616_s4 + $0x38] sm:$0xff] }
 0x123   : > { %1189 = vmatprep.subr.mxu1 %v843_v62  ;;  %1247 = vmatprep.mubr.f32.mxu1 %v785_v44  ;;  %v942_v44 = vld [vmem:[%s3616_s4 + $0x4b0] sm:$0xff]  ;;  %v927_v62 = vld [vmem:[%s3616_s4 + $0x438] sm:$0xff] }
 0x124   : > { %1266 = vmatprep.subr.mxu0 %v971_v63  ;;  %1190 = vmatpush1.msra.mxu1 %v842_v0  ;;  %v798_v63 = vld [vmem:[%s3616_s4 + $0x30] sm:$0xff]  ;;  %v1553_v18 = vld [vmem:[%s3621_s9 + $0xf8] sm:$0xff] }
 0x125   : > { %1267 = vmatpush1.msra.mxu0 %v970_v1  ;;  %1191 = vmatprep.subr.mxu1 %v839_v2  ;;  %v926_v0 = vld [vmem:[%s3616_s4 + $0x430] sm:$0xff]  ;;  %v795_v1 = vld [vmem:[%s3616_s4 + $0x18] sm:$0xff] }
 0x126   : > { %1268 = vmatprep.subr.mxu0 %v967_v4  ;;  %1192 = vmatpush1.msra.mxu1 %v838_v5  ;;  %v923_v2 = vld [vmem:[%s3616_s4 + $0x418] sm:$0xff]  ;;  %v922_v4 = vld [vmem:[%s3616_s4 + $0x410] sm:$0xff] }
 0x127   : > { %1269 = vmatpush1.msra.mxu0 %v966_v6  ;;  %1193 = vmatprep.subr.mxu1 %v835_v7  ;;  %v919_v5 = vld [vmem:[%s3616_s4 + $0x3f8] sm:$0xff]  ;;  %v918_v7 = vld [vmem:[%s3616_s4 + $0x3f0] sm:$0xff] }
 0x128   : > { %1270 = vmatprep.subr.mxu0 %v963_v8  ;;  %1194 = vmatpush1.msra.mxu1 %v834_v9  ;;  %v999_v6 = vld [vmem:[%s3616_s4 + $0x678] sm:$0xff]  ;;  %v998_v8 = vld [vmem:[%s3616_s4 + $0x670] sm:$0xff] }
 0x129   : > { %1271 = vmatpush1.msra.mxu0 %v962_v10  ;;  %1195 = vmatprep.subr.mxu1 %v831_v11  ;;  %v915_v9 = vld [vmem:[%s3616_s4 + $0x3d8] sm:$0xff]  ;;  %v914_v11 = vld [vmem:[%s3616_s4 + $0x3d0] sm:$0xff] }
 0x12a   : > { %1272 = vmatprep.subr.mxu0 %v959_v13  ;;  %1196 = vmatpush1.msra.mxu1 %v830_v14  ;;  %v995_v10 = vld [vmem:[%s3616_s4 + $0x658] sm:$0xff] }
 0x12b   : > { %1273 = vmatpush1.msra.mxu0 %v958_v15  ;;  %1197 = vmatprep.subr.mxu1 %v827_v16  ;;  %v911_v13 = vld [vmem:[%s3616_s4 + $0x3b8] sm:$0xff]  ;;  %v910_v15 = vld [vmem:[%s3616_s4 + $0x3b0] sm:$0xff] }
 0x12c   : > { %1274 = vmatprep.subr.mxu0 %v955_v17  ;;  %1198 = vmatpush1.msra.mxu1 %v826_v19  ;;  %v991_v14 = vld [vmem:[%s3616_s4 + $0x638] sm:$0xff]  ;;  %v990_v16 = vld [vmem:[%s3616_s4 + $0x630] sm:$0xff] }
 0x12d   : > { %1275 = vmatpush1.msra.mxu0 %v954_v20  ;;  %1199 = vmatprep.subr.mxu1 %v823_v21  ;;  %v907_v17 = vld [vmem:[%s3616_s4 + $0x398] sm:$0xff]  ;;  %v906_v20 = vld [vmem:[%s3616_s4 + $0x390] sm:$0xff] }
 0x12e   : > { %1276 = vmatprep.subr.mxu0 %v951_v23  ;;  %1200 = vmatpush1.msra.mxu1 %v822_v27  ;;  %v987_v19 = vld [vmem:[%s3616_s4 + $0x618] sm:$0xff]  ;;  %v986_v21 = vld [vmem:[%s3616_s4 + $0x610] sm:$0xff] }
 0x12f   : > { %1277 = vmatpush1.msra.mxu0 %v950_v30  ;;  %1201 = vmatprep.subr.mxu1 %v819_v31  ;;  %v903_v23 = vld [vmem:[%s3616_s4 + $0x378] sm:$0xff]  ;;  %v902_v30 = vld [vmem:[%s3616_s4 + $0x370] sm:$0xff] }
 0x130   : > { %1278 = vmatprep.subr.mxu0 %v947_v33  ;;  %1202 = vmatpush1.msra.mxu1 %v818_v34  ;;  %v1376_v27 = vld [vmem:[%s3618_s6 + $0xf8] sm:$0xff]  ;;  %v1375_v31 = vld [vmem:[%s3618_s6 + $0xf0] sm:$0xff]  ;;  %v1374_v34 = vld [vmem:[%s3618_s6 + $0xe8] sm:$0xff] }
 0x131   : > { %1279 = vmatpush1.msra.mxu0 %v946_v35  ;;  %1099 = vmatprep.mubr.f32.mxu0 %v789_v32  ;;  %v899_v33 = vld [vmem:[%s3616_s4 + $0x358] sm:$0xff]  ;;  %v898_v35 = vld [vmem:[%s3616_s4 + $0x350] sm:$0xff] }
 0x132   : > { %1203 = vmatprep.subr.mxu1 %v815_v39  ;;  %1280 = vmatprep.subr.mxu0 %v943_v40  ;;  %v1373_v39 = vld [vmem:[%s3618_s6 + $0xe0] sm:$0xff]  ;;  %v895_v40 = vld [vmem:[%s3616_s4 + $0x338] sm:$0xff] }
 0x133   : > { %1100 = vmatmul.mubr.f32.gmra.mxu0 %v788_v38  ;;  %1204 = vmatpush1.msra.mxu1 %v814_v43  ;;  %v1371_v43 = vld [vmem:[%s3618_s6 + $0xd0] sm:$0xff]  ;;  %v1396_v22 = vld [vmem:[%s3618_s6 + $0x198] sm:$0xff] }
 0x134   : > { %1281 = vmatpush1.msra.mxu0 %v942_v44  ;;  %1205 = vmatprep.subr.mxu1 %v811_v48  ;;  %v891_v44 = vld [vmem:[%s3616_s4 + $0x318] sm:$0xff]  ;;  %v1370_v48 = vld [vmem:[%s3618_s6 + $0xc8] sm:$0xff] }
 0x135   : > { %1282 = vmatprep.subr.mxu0 %v939_v49  ;;  %2053 = vmatprep.mubr.msk.f32.mxu0 %vm1022_vm1, %v787_v45  ;;  %v802_v45 = vld [vmem:[%s3616_s4 + $0x50] sm:$0xff] }
 0x136   : > { %1206 = vmatpush1.msra.mxu1 %v810_v50  ;;  %1283 = vmatpush1.msra.mxu0 %v938_v52  ;;  %v890_v49 = vld [vmem:[%s3616_s4 + $0x310] sm:$0xff]  ;;  %v1369_v50 = vld [vmem:[%s3618_s6 + $0xc0] sm:$0xff]  ;;  %v887_v52 = vld [vmem:[%s3616_s4 + $0x2f8] sm:$0xff] }
 0x137   : > { %1207 = vmatprep.subr.mxu1 %v807_v53  ;;  %1284 = vmatprep.subr.mxu0 %v935_v54  ;;  %v1368_v53 = vld [vmem:[%s3618_s6 + $0xb8] sm:$0xff]  ;;  %v886_v54 = vld [vmem:[%s3616_s4 + $0x2f0] sm:$0xff] }
 0x138   : > { %1208 = vmatpush1.msra.mxu1 %v806_v55  ;;  %1285 = vmatpush1.msra.mxu0 %v934_v58  ;;  %v1367_v55 = vld [vmem:[%s3618_s6 + $0xb0] sm:$0xff]  ;;  %v883_v58 = vld [vmem:[%s3616_s4 + $0x2d8] sm:$0xff] }
 0x139   : > { %1209 = vmatprep.subr.mxu1 %v803_v59  ;;  %1286 = vmatprep.subr.mxu0 %v931_v41  ;;  %v1366_v59 = vld [vmem:[%s3618_s6 + $0xa8] sm:$0xff]  ;;  %v882_v41 = vld [vmem:[%s3616_s4 + $0x2d0] sm:$0xff] }
 0x13a   : > { %1210 = vmatpush1.msra.mxu1 %v802_v45  ;;  %1287 = vmatpush1.msra.mxu0 %v930_v60  ;;  %v1365_v45 = vld [vmem:[%s3618_s6 + $0xa0] sm:$0xff]  ;;  %v879_v60 = vld [vmem:[%s3616_s4 + $0x2b8] sm:$0xff] }
 0x13b   : > { %1211 = vmatprep.subr.mxu1 %v799_v61  ;;  %1288 = vmatprep.subr.mxu0 %v927_v62  ;;  %v1364_v61 = vld [vmem:[%s3618_s6 + $0x98] sm:$0xff]  ;;  %v878_v62 = vld [vmem:[%s3616_s4 + $0x2b0] sm:$0xff] }
 0x13c   : > { %1212 = vmatpush1.msra.mxu1 %v798_v63  ;;  %1289 = vmatpush1.msra.mxu0 %v926_v0  ;;  %v1363_v63 = vld [vmem:[%s3618_s6 + $0x90] sm:$0xff]  ;;  %v875_v0 = vld [vmem:[%s3616_s4 + $0x298] sm:$0xff] }
 0x13d   : > { %1213 = vmatprep.subr.mxu1 %v795_v1  ;;  %1290 = vmatprep.subr.mxu0 %v923_v2  ;;  %v1362_v1 = vld [vmem:[%s3618_s6 + $0x88] sm:$0xff]  ;;  %v874_v2 = vld [vmem:[%s3616_s4 + $0x290] sm:$0xff] }
 0x13e   : > { %1214 = vmatpush1.msra.mxu1 %v794_v3  ;;  %1291 = vmatpush1.msra.mxu0 %v922_v4  ;;  %v1361_v3 = vld [vmem:[%s3618_s6 + $0x80] sm:$0xff]  ;;  %v871_v4 = vld [vmem:[%s3616_s4 + $0x278] sm:$0xff] }
 0x13f   : > { %1215 = vmatprep.subr.mxu1 %v919_v5  ;;  %1316 = vmatprep.subr.mxu0 %v999_v6  ;;  %v1360_v5 = vld [vmem:[%s3618_s6 + $0x78] sm:$0xff]  ;;  %v870_v6 = vld [vmem:[%s3616_s4 + $0x270] sm:$0xff] }
 0x140   : > { %1216 = vmatpush2.msra.mxu1 %v918_v7  ;;  %1317 = vmatpush2.msra.mxu0 %v998_v8  ;;  %v1359_v7 = vld [vmem:[%s3618_s6 + $0x70] sm:$0xff]  ;;  %v867_v8 = vld [vmem:[%s3616_s4 + $0x258] sm:$0xff] }
 0x141   : > { %1217 = vmatprep.subr.mxu1 %v915_v9  ;;  %1318 = vmatprep.subr.mxu0 %v995_v10  ;;  %v1358_v9 = vld [vmem:[%s3618_s6 + $0x68] sm:$0xff]  ;;  %v866_v10 = vld [vmem:[%s3616_s4 + $0x250] sm:$0xff] }
 0x142   : > { %1218 = vmatpush2.msra.mxu1 %v914_v11  ;;  %1319 = vmatpush2.msra.mxu0 %v994_v12  ;;  %v1357_v11 = vld [vmem:[%s3618_s6 + $0x60] sm:$0xff]  ;;  %v863_v12 = vld [vmem:[%s3616_s4 + $0x238] sm:$0xff] }
 0x143   : > { %1219 = vmatprep.subr.mxu1 %v911_v13  ;;  %1320 = vmatprep.subr.mxu0 %v991_v14  ;;  %v1356_v13 = vld [vmem:[%s3618_s6 + $0x58] sm:$0xff]  ;;  %v862_v14 = vld [vmem:[%s3616_s4 + $0x230] sm:$0xff] }
 0x144   : > { %1220 = vmatpush2.msra.mxu1 %v910_v15  ;;  %1321 = vmatpush2.msra.mxu0 %v990_v16  ;;  %v1355_v15 = vld [vmem:[%s3618_s6 + $0x50] sm:$0xff]  ;;  %v859_v16 = vld [vmem:[%s3616_s4 + $0x218] sm:$0xff] }
 0x145   : > { %1221 = vmatprep.subr.mxu1 %v907_v17  ;;  %1322 = vmatprep.subr.mxu0 %v987_v19  ;;  %v1354_v17 = vld [vmem:[%s3618_s6 + $0x48] sm:$0xff]  ;;  %v858_v19 = vld [vmem:[%s3616_s4 + $0x210] sm:$0xff] }
 0x146   : > { %1222 = vmatpush2.msra.mxu1 %v906_v20  ;;  %1323 = vmatpush2.msra.mxu0 %v986_v21  ;;  %v1353_v20 = vld [vmem:[%s3618_s6 + $0x40] sm:$0xff]  ;;  %v1352_v21 = vld [vmem:[%s3618_s6 + $0x38] sm:$0xff] }
 0x147   : > { %1223 = vmatprep.subr.mxu1 %v903_v23  ;;  %1325 = vmatmul.mubr.f32.vlgmr.msra.gmra.mxu0 %v786_v42  ;;  %v894_v42 = vld [vmem:[%s3616_s4 + $0x330] sm:$0xff] }
 0x148   : > { %1415 = vmatprep.subr.mxu0 %v1376_v27  ;;  %1224 = vmatpush2.msra.mxu1 %v902_v30  ;;  %v1351_v23 = vld [vmem:[%s3618_s6 + $0x30] sm:$0xff]  ;;  %v1350_v27 = vld [vmem:[%s3618_s6 + $0x28] sm:$0xff]  ;;  %v1349_v30 = vld [vmem:[%s3618_s6 + $0x20] sm:$0xff] }
 0x149   : > { %1416 = vmatpush1.msra.mxu0 %v1375_v31  ;;  %1225 = vmatprep.subr.mxu1 %v899_v33  ;;  %v1348_v31 = vld [vmem:[%s3618_s6 + $0x18] sm:$0xff]  ;;  %v1551_v33 = vld [vmem:[%s3621_s9 + $0xe8] sm:$0xff] }
 0x14a   : > { %1417 = vmatprep.subr.mxu0 %v1374_v34  ;;  %1226 = vmatpush2.msra.mxu1 %v898_v35  ;;  %v1394_v34 = vld [vmem:[%s3618_s6 + $0x188] sm:$0xff] }
 0x14b   : > { %1418 = vmatpush1.msra.mxu0 %v1373_v39  ;;  %1227 = vmatprep.subr.mxu1 %v895_v40  ;;  %v1535_v35 = vld [vmem:[%s3621_s9 + $0x68] sm:$0xff]  ;;  %v1393_v39 = vld [vmem:[%s3618_s6 + $0x180] sm:$0xff] }
 0x14c   : > { %1419 = vmatprep.subr.mxu0 %v1372_v36  ;;  %1228 = vmatpush2.msra.mxu1 %v894_v42  ;;  %v1550_v40 = vld [vmem:[%s3621_s9 + $0xe0] sm:$0xff]  ;;  %v1392_v36 = vld [vmem:[%s3618_s6 + $0x178] sm:$0xff] }
 0x14d   : > { %1420 = vmatpush1.msra.mxu0 %v1371_v43  ;;  %1229 = vmatprep.subr.mxu1 %v891_v44  ;;  %v1534_v42 = vld [vmem:[%s3621_s9 + $0x60] sm:$0xff]  ;;  %v1391_v43 = vld [vmem:[%s3618_s6 + $0x170] sm:$0xff]  ;;  %v1549_v44 = vld [vmem:[%s3621_s9 + $0xd8] sm:$0xff] }
 0x14e   : > { %1421 = vmatprep.subr.mxu0 %v1370_v48  ;;  %1230 = vmatpush2.msra.mxu1 %v890_v49  ;;  %v1390_v48 = vld [vmem:[%s3618_s6 + $0x168] sm:$0xff]  ;;  %v1533_v49 = vld [vmem:[%s3621_s9 + $0x58] sm:$0xff] }
 0x14f   : > { %1422 = vmatpush1.msra.mxu0 %v1369_v50  ;;  %1231 = vmatprep.subr.mxu1 %v887_v52  ;;  %v1389_v50 = vld [vmem:[%s3618_s6 + $0x160] sm:$0xff]  ;;  %v1548_v52 = vld [vmem:[%s3621_s9 + $0xd0] sm:$0xff] }
 0x150   : > { %1423 = vmatprep.subr.mxu0 %v1368_v53  ;;  %1232 = vmatpush2.msra.mxu1 %v886_v54  ;;  %v1388_v53 = vld [vmem:[%s3618_s6 + $0x158] sm:$0xff]  ;;  %v1532_v54 = vld [vmem:[%s3621_s9 + $0x50] sm:$0xff] }
 0x151   : > { %1424 = vmatpush1.msra.mxu0 %v1367_v55  ;;  %1233 = vmatprep.subr.mxu1 %v883_v58  ;;  %v1387_v55 = vld [vmem:[%s3618_s6 + $0x150] sm:$0xff]  ;;  %v1547_v58 = vld [vmem:[%s3621_s9 + $0xc8] sm:$0xff] }
 0x152   : > { %1425 = vmatprep.subr.mxu0 %v1366_v59  ;;  %1234 = vmatpush2.msra.mxu1 %v882_v41  ;;  %v1386_v59 = vld [vmem:[%s3618_s6 + $0x148] sm:$0xff] }
 0x153   : > { %1426 = vmatpush1.msra.mxu0 %v1365_v45  ;;  %1235 = vmatprep.subr.mxu1 %v879_v60  ;;  %v1531_v41 = vld [vmem:[%s3621_s9 + $0x48] sm:$0xff]  ;;  %v1385_v45 = vld [vmem:[%s3618_s6 + $0x140] sm:$0xff] }
 0x154   : > { %1427 = vmatprep.subr.mxu0 %v1364_v61  ;;  %1236 = vmatpush2.msra.mxu1 %v878_v62  ;;  %v1546_v60 = vld [vmem:[%s3621_s9 + $0xc0] sm:$0xff]  ;;  %v1384_v61 = vld [vmem:[%s3618_s6 + $0x138] sm:$0xff] }
 0x155   : > { %1428 = vmatpush1.msra.mxu0 %v1363_v63  ;;  %1237 = vmatprep.subr.mxu1 %v875_v0  ;;  %v1530_v62 = vld [vmem:[%s3621_s9 + $0x40] sm:$0xff]  ;;  %v1383_v63 = vld [vmem:[%s3618_s6 + $0x130] sm:$0xff]  ;;  %v1545_v0 = vld [vmem:[%s3621_s9 + $0xb8] sm:$0xff] }
 0x156   : > { %1429 = vmatprep.subr.mxu0 %v1362_v1  ;;  %1238 = vmatpush2.msra.mxu1 %v874_v2  ;;  %v1382_v1 = vld [vmem:[%s3618_s6 + $0x128] sm:$0xff]  ;;  %v1529_v2 = vld [vmem:[%s3621_s9 + $0x38] sm:$0xff] }
 0x157   : > { %1430 = vmatpush1.msra.mxu0 %v1361_v3  ;;  %1239 = vmatprep.subr.mxu1 %v871_v4  ;;  %v1381_v3 = vld [vmem:[%s3618_s6 + $0x120] sm:$0xff]  ;;  %v1544_v4 = vld [vmem:[%s3621_s9 + $0xb0] sm:$0xff] }
 0x158   : > { %1431 = vmatprep.subr.mxu0 %v1360_v5  ;;  %1240 = vmatpush2.msra.mxu1 %v870_v6  ;;  %v1380_v5 = vld [vmem:[%s3618_s6 + $0x118] sm:$0xff]  ;;  %v1528_v6 = vld [vmem:[%s3621_s9 + $0x30] sm:$0xff] }
 0x159   : > { %1432 = vmatpush1.msra.mxu0 %v1359_v7  ;;  %1241 = vmatprep.subr.mxu1 %v867_v8  ;;  %v1379_v7 = vld [vmem:[%s3618_s6 + $0x110] sm:$0xff]  ;;  %v1543_v8 = vld [vmem:[%s3621_s9 + $0xa8] sm:$0xff] }
 0x15a   : > { %1433 = vmatprep.subr.mxu0 %v1358_v9  ;;  %1242 = vmatpush2.msra.mxu1 %v866_v10  ;;  %v1378_v9 = vld [vmem:[%s3618_s6 + $0x108] sm:$0xff] }
 0x15b   : > { %1434 = vmatpush1.msra.mxu0 %v1357_v11  ;;  %1243 = vmatprep.subr.mxu1 %v863_v12  ;;  %v1527_v10 = vld [vmem:[%s3621_s9 + $0x28] sm:$0xff]  ;;  %v1377_v11 = vld [vmem:[%s3618_s6 + $0x100] sm:$0xff] }
 0x15c   : > { %1435 = vmatprep.subr.mxu0 %v1356_v13  ;;  %1244 = vmatpush2.msra.mxu1 %v862_v14  ;;  %v1542_v12 = vld [vmem:[%s3621_s9 + $0xa0] sm:$0xff] }
 0x15d   : > { %1436 = vmatpush1.msra.mxu0 %v1355_v15  ;;  %1245 = vmatprep.subr.mxu1 %v859_v16  ;;  %v493_v13 = vld [vmem:[%s3129_s12] sm:$0xff]  ;;  %v496_v15 = vld [vmem:[%s3129_s12 + $0x18] sm:$0xff] }
 0x15e   : > { %1437 = vmatprep.subr.mxu0 %v1354_v17  ;;  %1246 = vmatpush2.msra.mxu1 %v858_v19  ;;  %v1526_v14 = vld [vmem:[%s3621_s9 + $0x20] sm:$0xff]  ;;  %v1541_v16 = vld [vmem:[%s3621_s9 + $0x98] sm:$0xff]  ;;  %v1540_v19 = vld [vmem:[%s3621_s9 + $0x90] sm:$0xff] }
 0x15f   : > { %1438 = vmatpush1.msra.mxu0 %v1353_v20  ;;  %1248 = vmatmul.mubr.f32.vlgmr.msra.gmra.mxu1 %v784_v47  ;;  %v1347_v47 = vld [vmem:[%s3618_s6 + $0x10] sm:$0xff]  ;;  %v1525_v17 = vld [vmem:[%s3621_s9 + $0x18] sm:$0xff] }
 0x160   : > { %1439 = vmatprep.subr.mxu0 %v1352_v21  ;;  %1253 = vmatprep.mubr.f32.mxu1 %v789_v32  ;;  %v1536_v32 = vld [vmem:[%s3621_s9 + $0x70] sm:$0xff] }
 0x161   : > { %1440 = vmatpush1.msra.mxu0 %v1351_v23  ;;  %2054 = vmatprep.mubr.msk.f32.mxu0 %vm1022_vm1, %v791_v57  ;;  %v1537_v57 = vld [vmem:[%s3621_s9 + $0x78] sm:$0xff]  ;;  %v495_v20 = vld [vmem:[%s3129_s12 + $0x10] sm:$0xff]  ;;  %v1539_v23 = vld [vmem:[%s3621_s9 + $0x88] sm:$0xff]  ;;  %s2046_s12 = sshll.u32 %s3629_s20, 3 }
 0x162   : > { %1441 = vmatprep.subr.mxu0 %v1350_v27  ;;  %1331 = vmatmul.mubr.f32.gmra.mxu0 %v790_v56  ;;  %v1552_v56 = vld [vmem:[%s3621_s9 + $0xf0] sm:$0xff]  ;;  %v2225_v27 = vmov 0.0   ;;  %s487_s26 = scalar_lea.vmem %s3625_s13, %s2046_s12 }
 0x163   : > { %1442 = vmatpush1.msra.mxu0 %v1349_v30  ;;  %1254 = vmatmul.mubr.f32.gmra.mxu1 %v788_v38  ;;  %v1395_v38 = vld [vmem:[%s3618_s6 + $0x190] sm:$0xff]  ;;  %v1523_v30 = vld [vmem:[%s3621_s9 + $0x8] sm:$0xff] }
 0x164   : > { %1443 = vmatprep.subr.mxu0 %v1348_v31  ;;  %2055 = vmatprep.mubr.msk.f32.mxu0 %vm623_vm0, %v494_v37  ;;  %v1524_v21 = vld [vmem:[%s3621_s9 + $0x10] sm:$0xff]  ;;  %v1538_v31 = vld [vmem:[%s3621_s9 + $0x80] sm:$0xff] }
 0x165   : > { %1444 = vmatpush1.msra.mxu0 %v1347_v47  ;;  %2072 = vmatprep.subr.mxu1 %v1553_v18  ;;  %v1522_v37 = vld [vmem:[%s3621_s9] sm:$0xff]  ;;  %v1511_v47 = vld [vmem:[%s3620_s8 + $0x78] sm:$0xff]  ;;  %v1510_v18 = vld [vmem:[%s3620_s8 + $0x70] sm:$0xff] }
 0x166   : > { %1445 = vmatprep.subr.mxu0 %v1346_v51  ;;  %2073 = vmatpush3.msra.mxu1 %v1537_v57  ;;  %v1509_v51 = vld [vmem:[%s3620_s8 + $0x68] sm:$0xff]  ;;  %v1508_v57 = vld [vmem:[%s3620_s8 + $0x60] sm:$0xff] }
 0x167   : > { %1446 = vmatpush1.msra.mxu0 %v1345_v46  ;;  %2074 = vmatprep.subr.mxu1 %v1552_v56  ;;  %v1507_v46 = vld [vmem:[%s3620_s8 + $0x58] sm:$0xff]  ;;  %v1506_v56 = vld [vmem:[%s3620_s8 + $0x50] sm:$0xff] }
 0x168   : > { %1459 = vmatprep.subr.mxu0 %v1396_v22  ;;  %2075 = vmatpush3.msra.mxu1 %v1536_v32  ;;  %v1505_v22 = vld [vmem:[%s3620_s8 + $0x48] sm:$0xff]  ;;  %v1504_v32 = vld [vmem:[%s3620_s8 + $0x40] sm:$0xff] }
 0x169   : > { %1460 = vmatpush2.msra.mxu0 %v1395_v38  ;;  %2076 = vmatprep.subr.mxu1 %v1551_v33  ;;  %v1503_v38 = vld [vmem:[%s3620_s8 + $0x38] sm:$0xff]  ;;  %v1502_v33 = vld [vmem:[%s3620_s8 + $0x30] sm:$0xff] }
 0x16a   : > { %1461 = vmatprep.subr.mxu0 %v1394_v34  ;;  %2077 = vmatpush3.msra.mxu1 %v1535_v35  ;;  %v1501_v34 = vld [vmem:[%s3620_s8 + $0x28] sm:$0xff]  ;;  %v1500_v35 = vld [vmem:[%s3620_s8 + $0x20] sm:$0xff] }
 0x16b   : > { %1462 = vmatpush2.msra.mxu0 %v1393_v39  ;;  %2078 = vmatprep.subr.mxu1 %v1550_v40  ;;  %v1499_v39 = vld [vmem:[%s3620_s8 + $0x18] sm:$0xff]  ;;  %v1498_v40 = vld [vmem:[%s3620_s8 + $0x10] sm:$0xff] }
 0x16c   : > { %1463 = vmatprep.subr.mxu0 %v1392_v36  ;;  %2079 = vmatpush3.msra.mxu1 %v1534_v42  ;;  %v1497_v36 = vld [vmem:[%s3620_s8 + $0x8] sm:$0xff]  ;;  %v1496_v42 = vld [vmem:[%s3620_s8] sm:$0xff] }
 0x16d   : > { %1464 = vmatpush2.msra.mxu0 %v1391_v43  ;;  %2080 = vmatprep.subr.mxu1 %v1549_v44  ;;  %v1521_v43 = vld [vmem:[%s3620_s8 + $0xc8] sm:$0xff]  ;;  %v1520_v44 = vld [vmem:[%s3620_s8 + $0xc0] sm:$0xff] }
 0x16e   : > { %1465 = vmatprep.subr.mxu0 %v1390_v48  ;;  %2081 = vmatpush3.msra.mxu1 %v1533_v49  ;;  %v1519_v48 = vld [vmem:[%s3620_s8 + $0xb8] sm:$0xff]  ;;  %v1518_v49 = vld [vmem:[%s3620_s8 + $0xb0] sm:$0xff] }
 0x16f   : > { %1466 = vmatpush2.msra.mxu0 %v1389_v50  ;;  %2082 = vmatprep.subr.mxu1 %v1548_v52  ;;  %v1517_v50 = vld [vmem:[%s3620_s8 + $0xa8] sm:$0xff]  ;;  %v1516_v52 = vld [vmem:[%s3620_s8 + $0xa0] sm:$0xff] }
 0x170   : > { %1467 = vmatprep.subr.mxu0 %v1388_v53  ;;  %2083 = vmatpush3.msra.mxu1 %v1532_v54  ;;  %v1515_v53 = vld [vmem:[%s3620_s8 + $0x98] sm:$0xff]  ;;  %v1514_v54 = vld [vmem:[%s3620_s8 + $0x90] sm:$0xff] }
 0x171   : > { %1468 = vmatpush2.msra.mxu0 %v1387_v55  ;;  %2084 = vmatprep.subr.mxu1 %v1547_v58  ;;  %v1513_v55 = vld [vmem:[%s3620_s8 + $0x88] sm:$0xff]  ;;  %v1512_v58 = vld [vmem:[%s3620_s8 + $0x80] sm:$0xff] }
 0x172   : > { %1469 = vmatprep.subr.mxu0 %v1386_v59  ;;  %2085 = vmatpush3.msra.mxu1 %v1531_v41  ;;  %v3433_v59 = vld [vmem:[%s3617_s5] sm:$0xf] }
 0x173   : > { %1470 = vmatpush2.msra.mxu0 %v1385_v45  ;;  %2086 = vmatprep.subr.mxu1 %v1546_v60  ;;  %v1005_v41 = vrot.slane %v3433_v59, %v2678_v26  ;;  %v1009_v45 = vrot.slane %v3433_v59, %v2684_v28 }
 0x174   : > { %1471 = vmatprep.subr.mxu0 %v1384_v61  ;;  %2087 = vmatpush3.msra.mxu1 %v1530_v62 }
 0x175   : > { %1472 = vmatpush2.msra.mxu0 %v1383_v63  ;;  %2088 = vmatprep.subr.mxu1 %v1545_v0 }
 0x176   : > { %1473 = vmatprep.subr.mxu0 %v1382_v1  ;;  %2089 = vmatpush3.msra.mxu1 %v1529_v2 }
 0x177   : > { %1474 = vmatpush2.msra.mxu0 %v1381_v3  ;;  %2090 = vmatprep.subr.mxu1 %v1544_v4 }
 0x178   : > { %1475 = vmatprep.subr.mxu0 %v1380_v5  ;;  %2091 = vmatpush3.msra.mxu1 %v1528_v6  ;;  %v1569_v6 = vld [vmem:[%s3621_s9 + $0x178] sm:$0xff] }
 0x179   : > { %1476 = vmatpush2.msra.mxu0 %v1379_v7  ;;  %2092 = vmatprep.subr.mxu1 %v1543_v8  ;;  %v1568_v7 = vld [vmem:[%s3621_s9 + $0x170] sm:$0xff]  ;;  %v1567_v8 = vld [vmem:[%s3621_s9 + $0x168] sm:$0xff] }
 0x17a   : > { %1477 = vmatprep.subr.mxu0 %v1378_v9  ;;  %2093 = vmatpush3.msra.mxu1 %v1527_v10  ;;  %v1566_v9 = vld [vmem:[%s3621_s9 + $0x160] sm:$0xff]  ;;  %v1565_v10 = vld [vmem:[%s3621_s9 + $0x158] sm:$0xff] }
 0x17b   : > { %1478 = vmatpush2.msra.mxu0 %v1377_v11  ;;  %2094 = vmatprep.subr.mxu1 %v1542_v12  ;;  %v1564_v11 = vld [vmem:[%s3621_s9 + $0x150] sm:$0xff]  ;;  %v1563_v12 = vld [vmem:[%s3621_s9 + $0x148] sm:$0xff] }
 0x17c   : > { %1480 = vmatmul.mubr.f32.vlgmr.msra.gmra.mxu0 %v493_v13  ;;  %2095 = vmatpush3.msra.mxu1 %v1526_v14  ;;  %v1562_v14 = vld [vmem:[%s3621_s9 + $0x140] sm:$0xff] }
 0x17d   : > { %2056 = vmatprep.mubr.msk.f32.mxu0 %vm623_vm0, %v496_v15  ;;  %2096 = vmatprep.subr.mxu1 %v1541_v16 }
 0x17e   : > { %2097 = vmatpush3.msra.mxu1 %v1525_v17  ;;  %1745 = vmatprep.subr.mxu0 %v2225_v27  ;;  %v1561_v17 = vld [vmem:[%s3621_s9 + $0x138] sm:$0xff] }
 0x17f   : > { %2098 = vmatprep.subr.mxu1 %v1540_v19  ;;  %1746 = vmatpush1.msra.mxu0 %v1511_v47 }
 0x180   : > { %1486 = vmatmul.mubr.f32.gmra.mxu0 %v495_v20  ;;  %2099 = vmatpush3.msra.mxu1 %v1524_v21 }
 0x181   : > { %2100 = vmatprep.subr.mxu1 %v1539_v23  ;;  %1747 = vmatprep.subr.mxu0 %v2225_v27 }
 0x182   : > { %2101 = vmatpush3.msra.mxu1 %v1523_v30  ;;  %1748 = vmatpush1.msra.mxu0 %v1510_v18  ;;  %v1560_v30 = vld [vmem:[%s3621_s9 + $0x130] sm:$0xff] }
 0x183   : > { %2102 = vmatprep.subr.mxu1 %v1538_v31  ;;  %1749 = vmatprep.subr.mxu0 %v2225_v27 }
 0x184   : > { %2103 = vmatpush3.msra.mxu1 %v1522_v37  ;;  %1750 = vmatpush1.msra.mxu0 %v1509_v51  ;;  %v1559_v37 = vld [vmem:[%s3621_s9 + $0x128] sm:$0xff]  ;;  %v1558_v51 = vld [vmem:[%s3621_s9 + $0x120] sm:$0xff] }
 0x185   : > { %1664 = vmatprep.subr.mxu1 %v2225_v27  ;;  %1751 = vmatprep.subr.mxu0 %v2225_v27 }
 0x186   : > { %1752 = vmatpush1.msra.mxu0 %v1508_v57  ;;  %v1557_v57 = vld [vmem:[%s3621_s9 + $0x118] sm:$0xff] }
 0x187   : > { %1753 = vmatprep.subr.mxu0 %v2225_v27 }
 0x188   : > { %1754 = vmatpush1.msra.mxu0 %v1507_v46  ;;  %v1556_v46 = vld [vmem:[%s3621_s9 + $0x110] sm:$0xff] }
 0x189   : > { %1755 = vmatprep.subr.mxu0 %v2225_v27 }
 0x18a   : > { %1756 = vmatpush1.msra.mxu0 %v1506_v56  ;;  %v1555_v56 = vld [vmem:[%s3621_s9 + $0x108] sm:$0xff] }
 0x18b   : > { %1757 = vmatprep.subr.mxu0 %v2225_v27 }
 0x18c   : > { %1758 = vmatpush1.msra.mxu0 %v1505_v22  ;;  %v1554_v22 = vld [vmem:[%s3621_s9 + $0x100] sm:$0xff] }
 0x18d   : > { %1759 = vmatprep.subr.mxu0 %v2225_v27 }
 0x18e   : > { %1760 = vmatpush1.msra.mxu0 %v1504_v32  ;;  %v1581_v32 = vld [vmem:[%s3621_s9 + $0x1d8] sm:$0xff] }
 0x18f   : > { %1761 = vmatprep.subr.mxu0 %v2225_v27 }
 0x190   : > { %1762 = vmatpush1.msra.mxu0 %v1503_v38  ;;  %v1580_v38 = vld [vmem:[%s3621_s9 + $0x1d0] sm:$0xff] }
 0x191   : > { %1763 = vmatprep.subr.mxu0 %v2225_v27 }
 0x192   : > { %1764 = vmatpush1.msra.mxu0 %v1502_v33  ;;  %v1579_v33 = vld [vmem:[%s3621_s9 + $0x1c8] sm:$0xff] }
 0x193   : > { %1765 = vmatprep.subr.mxu0 %v2225_v27 }
 0x194   : > { %1766 = vmatpush1.msra.mxu0 %v1501_v34  ;;  %v1578_v34 = vld [vmem:[%s3621_s9 + $0x1c0] sm:$0xff] }
 0x195   : > { %1767 = vmatprep.subr.mxu0 %v2225_v27 }
 0x196   : > { %1768 = vmatpush1.msra.mxu0 %v1500_v35  ;;  %v1577_v35 = vld [vmem:[%s3621_s9 + $0x1b8] sm:$0xff] }
 0x197   : > { %1769 = vmatprep.subr.mxu0 %v2225_v27 }
 0x198   : > { %1770 = vmatpush1.msra.mxu0 %v1499_v39  ;;  %v1576_v39 = vld [vmem:[%s3621_s9 + $0x1b0] sm:$0xff] }
 0x199   : > { %1771 = vmatprep.subr.mxu0 %v2225_v27 }
 0x19a   : > { %1772 = vmatpush1.msra.mxu0 %v1498_v40  ;;  %v1575_v40 = vld [vmem:[%s3621_s9 + $0x1a8] sm:$0xff] }
 0x19b   : > { %1773 = vmatprep.subr.mxu0 %v2225_v27 }
 0x19c   : > { %1774 = vmatpush1.msra.mxu0 %v1497_v36  ;;  %v1574_v36 = vld [vmem:[%s3621_s9 + $0x1a0] sm:$0xff] }
 0x19d   : > { %1775 = vmatprep.subr.mxu0 %v2225_v27 }
 0x19e   : > { %1776 = vmatpush1.msra.mxu0 %v1496_v42  ;;  %v1573_v42 = vld [vmem:[%s3621_s9 + $0x198] sm:$0xff] }
 0x19f   : > { %1789 = vmatprep.subr.mxu0 %v2225_v27 }
 0x1a0   : > { %1790 = vmatpush2.msra.mxu0 %v1521_v43  ;;  %v1572_v43 = vld [vmem:[%s3621_s9 + $0x190] sm:$0xff] }
 0x1a1   : > { %1791 = vmatprep.subr.mxu0 %v2225_v27 }
 0x1a2   : > { %1792 = vmatpush2.msra.mxu0 %v1520_v44  ;;  %v1571_v44 = vld [vmem:[%s3621_s9 + $0x188] sm:$0xff] }
 0x1a3   : > { %1793 = vmatprep.subr.mxu0 %v2225_v27 }
 0x1a4   : > { %1794 = vmatpush2.msra.mxu0 %v1519_v48  ;;  %v1570_v48 = vld [vmem:[%s3621_s9 + $0x180] sm:$0xff] }
 0x1a5   : > { %1795 = vmatprep.subr.mxu0 %v2225_v27 }
 0x1a6   : > { %1796 = vmatpush2.msra.mxu0 %v1518_v49 }
 0x1a7   : > { %1797 = vmatprep.subr.mxu0 %v2225_v27 }
 0x1a8   : > { %1798 = vmatpush2.msra.mxu0 %v1517_v50  ;;  %v1013_v50 = vrot.slane %v3433_v59, %v613_v25 }
 0x1a9   : > { %1799 = vmatprep.subr.mxu0 %v2225_v27 }
 0x1aa   : > { %1800 = vmatpush2.msra.mxu0 %v1516_v52  ;;  %v1017_v52 = vrot.slane %v3433_v59, %v617_v29 }
 0x1ab   : > { %1801 = vmatprep.subr.mxu0 %v2225_v27 }
 0x1ac   : > { %1802 = vmatpush2.msra.mxu0 %v1515_v53 }
 0x1ad   : > { %1803 = vmatprep.subr.mxu0 %v2225_v27 }
 0x1ae   : > { %1804 = vmatpush2.msra.mxu0 %v1514_v54 }
 0x1af   : > { %1805 = vmatprep.subr.mxu0 %v2225_v27 }
 0x1b0   : > { %1806 = vmatpush2.msra.mxu0 %v1513_v55 }
 0x1b1   : > { %1807 = vmatprep.subr.mxu0 %v2225_v27 }
 0x1b2   : > { %1808 = vmatpush2.msra.mxu0 %v1512_v58 }
 0x1dc   : > { %v1095_v60 = vpop.f32.mrf.mxu0  ;;  %v1172_v61 = vpop.f32.mrf.mxu1 }
 0x1dd   : > { %v1096_v62 = vadd.f32 %v1095_v60, %v1005_v41 }
 0x1de   : > { %v1097_v63 = vpop.f32.mrf.mxu0  ;;  %v1174_v0 = vpop.f32.mrf.mxu1 }
 0x1df   : > { %v1098_v1 = vadd.f32 %v1097_v63, %v1009_v45  ;;  %v1173_v2 = vadd.f32 %v1172_v61, %v1096_v62 }
 0x1e1   : > { %v1175_v3 = vadd.f32 %v1174_v0, %v1098_v1  ;;  %v1337_v5 = vmax.f32 %v1173_v2, 0.0  ;;  %v1178_v13 = vpop.f32.mrf.mxu1 }
 0x1e3   : > { %v1338_v4 = vmax.f32 %v1175_v3, 0.0  ;;  %v1180_v20 = vpop.f32.mrf.mxu1 }
 0x1e5   : > { %1653 = vmatprep.mubr.f32.mxu1 %v1338_v4  ;;  %v1397_v4 = vld [vmem:[%s3619_s7] sm:$0x3] }
 0x1e6   : > { %1654 = vmatmul.mubr.f32.vlgmr.msra.gmra.mxu1 %v1337_v5  ;;  %v1402_v5 = vrot.slane %v1397_v4, %v2678_v26  ;;  %v1843_v26 = vld [vmem:[%s3623_s11 + $0x60] sm:$0xf] }
 0x1e7   : > { %1665 = vmatpush1.msra.mxu1 %v1569_v6  ;;  %v1406_v6 = vrot.slane %v1397_v4, %v2684_v28  ;;  %v1842_v28 = vld [vmem:[%s3623_s11 + $0x58] sm:$0xff] }
 0x1e8   : > { %1666 = vmatprep.subr.mxu1 %v2225_v27 }
 0x1e9   : > { %1667 = vmatpush1.msra.mxu1 %v1568_v7 }
 0x1ea   : > { %1668 = vmatprep.subr.mxu1 %v2225_v27 }
 0x1eb   : > { %1669 = vmatpush1.msra.mxu1 %v1567_v8 }
 0x1ec   : > { %1670 = vmatprep.subr.mxu1 %v2225_v27 }
 0x1ed   : > { %1671 = vmatpush1.msra.mxu1 %v1566_v9 }
 0x1ee   : > { %1672 = vmatprep.subr.mxu1 %v2225_v27 }
 0x1ef   : > { %1673 = vmatpush1.msra.mxu1 %v1565_v10 }
 0x1f0   : > { %1674 = vmatprep.subr.mxu1 %v2225_v27 }
 0x1f1   : > { %1675 = vmatpush1.msra.mxu1 %v1564_v11 }
 0x1f2   : > { %1676 = vmatprep.subr.mxu1 %v2225_v27 }
 0x1f3   : > { %v1101_v15 = vpop.f32.mrf.mxu0  ;;  %1677 = vmatpush1.msra.mxu1 %v1563_v12 }
 0x1f4   : > { %v1102_v16 = vadd.f32 %v1101_v15, %v1005_v41  ;;  %1678 = vmatprep.subr.mxu1 %v2225_v27 }
 0x1f5   : > { %v1103_v19 = vpop.f32.mrf.mxu0  ;;  %1679 = vmatpush1.msra.mxu1 %v1562_v14 }
 0x1f6   : > { %v1104_v21 = vadd.f32 %v1103_v19, %v1009_v45  ;;  %v1179_v23 = vadd.f32 %v1178_v13, %v1102_v16  ;;  %1680 = vmatprep.subr.mxu1 %v2225_v27 }
 0x1f7   : > { %1681 = vmatpush1.msra.mxu1 %v1561_v17 }
 0x1f8   : > { %v1181_v31 = vadd.f32 %v1180_v20, %v1104_v21  ;;  %1682 = vmatprep.subr.mxu1 %v2225_v27  ;;  %v1341_v47 = vmax.f32 %v1179_v23, 0.0  ;;  %v1841_v20 = vld [vmem:[%s3623_s11 + $0x50] sm:$0xff]  ;;  %v1840_v21 = vld [vmem:[%s3623_s11 + $0x48] sm:$0xff]  ;;  %v1839_v23 = vld [vmem:[%s3623_s11 + $0x40] sm:$0xff] }
 0x1f9   : > { %1683 = vmatpush1.msra.mxu1 %v1560_v30  ;;  %v1838_v30 = vld [vmem:[%s3623_s11 + $0x38] sm:$0xff] }
 0x1fa   : > { %v1342_v18 = vmax.f32 %v1181_v31, 0.0  ;;  %1684 = vmatprep.subr.mxu1 %v2225_v27  ;;  %v1837_v31 = vld [vmem:[%s3623_s11 + $0x30] sm:$0xff] }
 0x1fb   : > { %1685 = vmatpush1.msra.mxu1 %v1559_v37  ;;  %v1836_v37 = vld [vmem:[%s3623_s11 + $0x28] sm:$0xff] }
 0x1fc   : > { %1658 = vmatprep.mubr.f32.mxu1 %v1342_v18  ;;  %1686 = vmatprep.subr.mxu1 %v2225_v27  ;;  %v1834_v18 = vld [vmem:[%s3623_s11 + $0x18] sm:$0xff] }
 0x1fd   : > { %1659 = vmatmul.mubr.f32.gmra.mxu1 %v1341_v47  ;;  %v1835_v47 = vld [vmem:[%s3623_s11 + $0x20] sm:$0xff] }
 0x1fe   : > { %1687 = vmatpush1.msra.mxu1 %v1558_v51  ;;  %v1833_v51 = vld [vmem:[%s3623_s11 + $0x10] sm:$0xff] }
 0x1ff   : > { %1688 = vmatprep.subr.mxu1 %v2225_v27 }
 0x200   : > { %1689 = vmatpush1.msra.mxu1 %v1557_v57  ;;  %v1832_v57 = vld [vmem:[%s3623_s11 + $0x8] sm:$0xff] }
 0x201   : > { %1690 = vmatprep.subr.mxu1 %v2225_v27 }
 0x202   : > { %1691 = vmatpush1.msra.mxu1 %v1556_v46  ;;  %v1831_v46 = vld [vmem:[%s3623_s11] sm:$0xff] }
 0x203   : > { %1692 = vmatprep.subr.mxu1 %v2225_v27 }
 0x204   : > { %1693 = vmatpush1.msra.mxu1 %v1555_v56 }
 0x205   : > { %1694 = vmatprep.subr.mxu1 %v2225_v27 }
 0x206   : > { %1695 = vmatpush1.msra.mxu1 %v1554_v22 }
 0x207   : > { %1704 = vmatprep.subr.mxu1 %v2225_v27  ;;  %v1326_v49 = vpop.f32.mrf.mxu0 }
 0x208   : > { %1705 = vmatpush2.msra.mxu1 %v1581_v32 }
 0x209   : > { %1706 = vmatprep.subr.mxu1 %v2225_v27  ;;  %v1328_v54 = vpop.f32.mrf.mxu0 }
 0x20a   : > { %1707 = vmatpush2.msra.mxu1 %v1580_v38 }
 0x20b   : > { %1708 = vmatprep.subr.mxu1 %v2225_v27 }
 0x20c   : > { %1709 = vmatpush2.msra.mxu1 %v1579_v33 }
 0x20d   : > { %1710 = vmatprep.subr.mxu1 %v2225_v27 }
 0x20e   : > { %1711 = vmatpush2.msra.mxu1 %v1578_v34 }
 0x20f   : > { %1712 = vmatprep.subr.mxu1 %v2225_v27 }
 0x210   : > { %1713 = vmatpush2.msra.mxu1 %v1577_v35 }
 0x211   : > { %1714 = vmatprep.subr.mxu1 %v2225_v27 }
 0x212   : > { %1715 = vmatpush2.msra.mxu1 %v1576_v39 }
 0x213   : > { %1716 = vmatprep.subr.mxu1 %v2225_v27 }
 0x214   : > { %1717 = vmatpush2.msra.mxu1 %v1575_v40 }
 0x215   : > { %1718 = vmatprep.subr.mxu1 %v2225_v27 }
 0x216   : > { %1719 = vmatpush2.msra.mxu1 %v1574_v36 }
 0x217   : > { %1720 = vmatprep.subr.mxu1 %v2225_v27 }
 0x218   : > { %1721 = vmatpush2.msra.mxu1 %v1573_v42 }
 0x219   : > { %1722 = vmatprep.subr.mxu1 %v2225_v27 }
 0x21a   : > { %1723 = vmatpush2.msra.mxu1 %v1572_v43  ;;  %v2061_v43 = vld [vmem:[%s3622_s10] ss:$0 sm:$0xff] }
 0x21b   : > { %1724 = vmatprep.subr.mxu1 %v2225_v27 }
 0x21c   : > { %1725 = vmatpush2.msra.mxu1 %v1571_v44 }
 0x21d   : > { %1726 = vmatprep.subr.mxu1 %v2225_v27 }
 0x21e   : > { %1727 = vmatpush2.msra.mxu1 %v1570_v48 }
 0x21f   : > { %v1249_v53 = vpop.f32.mrf.mxu1  ;;  %2125 = vmatprep.subr.msk.mxu1 %vm1858_vm3, %v1843_v26 }
 0x220   : > { %v1250_v55 = vadd.f32 %v1249_v53, %v1013_v50 }
 0x221   : > { %v1251_v58 = vpop.f32.mrf.mxu1 }
 0x222   : > { %v1252_v41 = vadd.f32 %v1251_v58, %v1017_v52  ;;  %v1332_v45 = vpop.f32.mrf.mxu0  ;;  %v1327_v60 = vadd.f32 %v1326_v49, %v1250_v55 }
 0x223   : > { %v1255_v61 = vpop.f32.mrf.mxu1 }
 0x224   : > { %v1329_v62 = vadd.f32 %v1328_v54, %v1252_v41  ;;  %v1256_v63 = vadd.f32 %v1255_v61, %v1013_v50  ;;  %v1334_v25 = vpop.f32.mrf.mxu0  ;;  %v1339_v2 = vmax.f32 %v1327_v60, 0.0  ;;  %v2062_v60 = vld [vmem:[#allocation2] ss:$0 sm:$0xff] }
 0x225   : > { %v1257_v0 = vpop.f32.mrf.mxu1 }
 0x226   : > { %v1340_v1 = vmax.f32 %v1329_v62, 0.0  ;;  %v1258_v27 = vadd.f32 %v1257_v0, %v1017_v52  ;;  %v1333_v24 = vadd.f32 %v1332_v45, %v1256_v63 }
 0x228   : > { %v1335_v3 = vadd.f32 %v1334_v25, %v1258_v27  ;;  %2057 = vmatprep.mubr.msk.f32.mxu1 %vm1582_vm2, %v1340_v1  ;;  %v1343_v59 = vmax.f32 %v1333_v24, 0.0 }
 0x229   : > { %1729 = vmatmul.mubr.f32.vlgmr.msra.gmra.mxu1 %v1339_v2 }
 0x22a   : > { %v1344_v29 = vmax.f32 %v1335_v3, 0.0  ;;  %2126 = vmatpush3.msk.msra.mxu1 %vm1858_vm3, %v1843_v26 }
 0x22b   : > { %2127 = vmatprep.subr.mxu1 %v1842_v28 }
 0x22c   : > { %2058 = vmatprep.mubr.msk.f32.mxu1 %vm1582_vm2, %v1344_v29  ;;  %2128 = vmatpush3.msra.mxu1 %v1842_v28 }
 0x22d   : > { %1734 = vmatmul.mubr.f32.gmra.mxu1 %v1343_v59  ;;  %2129 = vmatprep.subr.mxu1 %v1841_v20 }
 0x22e   : > { %2130 = vmatpush3.msra.mxu1 %v1841_v20 }
 0x22f   : > { %2131 = vmatprep.subr.mxu1 %v1840_v21 }
 0x230   : > { %2132 = vmatpush3.msra.mxu1 %v1840_v21 }
 0x231   : > { %2133 = vmatprep.subr.mxu1 %v1839_v23 }
 0x232   : > { %2134 = vmatpush3.msra.mxu1 %v1839_v23 }
 0x233   : > { %2135 = vmatprep.subr.mxu1 %v1838_v30 }
 0x234   : > { %2136 = vmatpush3.msra.mxu1 %v1838_v30 }
 0x235   : > { %2137 = vmatprep.subr.mxu1 %v1837_v31 }
 0x236   : > { %2138 = vmatpush3.msra.mxu1 %v1837_v31 }
 0x237   : > { %2139 = vmatprep.subr.mxu1 %v1836_v37 }
 0x238   : > { %2140 = vmatpush3.msra.mxu1 %v1836_v37 }
 0x239   : > { %2141 = vmatprep.subr.mxu1 %v1835_v47 }
 0x23a   : > { %2142 = vmatpush3.msra.mxu1 %v1835_v47 }
 0x23b   : > { %2143 = vmatprep.subr.mxu1 %v1834_v18 }
 0x23c   : > { %v1481_v7 = vpop.f32.mrf.mxu0  ;;  %2144 = vmatpush3.msra.mxu1 %v1834_v18 }
 0x23d   : > { %v1482_v8 = vadd.f32 %v1481_v7, %v1402_v5  ;;  %2145 = vmatprep.subr.mxu1 %v1833_v51 }
 0x23e   : > { %v1483_v9 = vpop.f32.mrf.mxu0  ;;  %2146 = vmatpush3.msra.mxu1 %v1833_v51 }
 0x23f   : > { %v1484_v10 = vadd.f32 %v1483_v9, %v1406_v6  ;;  %v1492_v13 = vmax.f32 %v1482_v8, 0.0  ;;  %2147 = vmatprep.subr.mxu1 %v1832_v57 }
 0x240   : > { %v1487_v11 = vpop.f32.mrf.mxu0  ;;  %2148 = vmatpush3.msra.mxu1 %v1832_v57 }
 0x241   : > { %v1493_v12 = vmax.f32 %v1484_v10, 0.0  ;;  %v1488_v14 = vadd.f32 %v1487_v11, %v1402_v5  ;;  %2149 = vmatprep.subr.mxu1 %v1831_v46 }
 0x242   : > { %v1489_v15 = vpop.f32.mrf.mxu0  ;;  %2150 = vmatpush3.msra.mxu1 %v1831_v46 }
 0x243   : > { %v1490_v16 = vadd.f32 %v1489_v15, %v1406_v6  ;;  %2059 = vmatprep.mubr.msk.f32.mxu0 %vm623_vm0, %v1493_v12  ;;  %v1494_v19 = vmax.f32 %v1488_v14, 0.0 }
 0x244   : > { %1810 = vmatmul.mubr.f32.vlgmr.msra.gmra.mxu0 %v1492_v13 }
 0x245   : > { %v1495_v17 = vmax.f32 %v1490_v16, 0.0 }
 0x247   : > { %2060 = vmatprep.mubr.msk.f32.mxu0 %vm623_vm0, %v1495_v17 }
 0x248   : > { %1815 = vmatmul.mubr.f32.gmra.mxu0 %v1494_v19 }
 0x2a6   : > { %v2104_v56 = vpop.f32.mrf.mxu1 }
 0x2a8   : > { %v2105_v22 = vpop.f32.mrf.mxu1 }
 0x2a9   : > { %v2106_v40 = vadd.f32 %v2105_v22, %v2104_v56 }
 0x2bd   : > { %v2107_v32 = vpop.f32.mrf.mxu1 }
 0x2bf   : > { %v2108_v38 = vpop.f32.mrf.mxu1 }
 0x2c0   : > { %v2109_v44 = vadd.f32 %v2108_v38, %v2107_v32 }
 0x2e9   : > { %v1730_v33 = vpop.f32.mrf.mxu1 }
 0x2ea   : > { %v1731_v36 = vadd.f32 %v2106_v40, %v1730_v33 }
 0x2eb   : > { %v1732_v34 = vpop.f32.mrf.mxu1 }
 0x2ed   : > { %v1735_v35 = vpop.f32.mrf.mxu1 }
 0x2ee   : > { %v1736_v50 = vadd.f32 %v2109_v44, %v1735_v35 }
 0x2ef   : > { %v1737_v39 = vpop.f32.mrf.mxu1 }
 0x304   : > { %v1811_v42 = vpop.f32.mrf.mxu0 }
 0x305   : > { %v1812_v48 = vadd.f32 %v1811_v42, %v1731_v36 }
 0x306   : > { %v1813_v49 = vpop.f32.mrf.mxu0 }
 0x307   : > { %v1827_v52 = vadd.f32 %v2061_v43, %v1812_v48 }
 0x308   : > { %v1816_v53 = vpop.f32.mrf.mxu0 }
 0x309   : > { %v1829_v54 = vmax.f32 %v1827_v52, 0.0  ;;  %v1817_v55 = vadd.f32 %v1816_v53, %v1736_v50 }
 0x30a   : > { %v1818_v58 = vpop.f32.mrf.mxu0 }
 0x30b   : > { %v1828_v41 = vadd.f32 %v2061_v43, %v1817_v55  ;;  %2151 = vmatprep.mubr.msk.f32.mxu1 %vm1851_vm4, %v1829_v54 }
 0x30d   : > { %v1830_v45 = vmax.f32 %v1828_v41, 0.0 }
 0x30f   : > { %2152 = vmatmul.mubr.msk.f32.vlgmr.msra.gmra.mxu1 %vm1851_vm4, %v1830_v45 }
 0x3cf   : > { %v2153_v61 = vpop.f32.mrf.mxu1 }
 0x3d0   : > { %v1934_v62 = vadd.f32 %v2153_v61, %v2062_v60 }
 0x3d1   : > { %v1928_v63 = vpop.f32.mrf.mxu1 }
 0x3d2   : > { %v2067_v0 = vmul.f32 -1.442695, %v1934_v62  ;;  %v1929_v25 = vadd.f32 %v2062_v60, %v1928_v63 }
 0x3d4   : > { %2176 = vpow2.f32 %v2067_v0  ;;  %v2066_v1 = vmul.f32 -1.442695, %v1929_v25 }
 0x3d6   : > { %2178 = vpow2.f32 %v2066_v1 }
 0x3e1   : > { %v2177_v27 = vpop.eup %2176 }
 0x3e2   : > { %v1944_v24 = vadd.f32 1.0, %v2177_v27 }
 0x3e3   : > { %v2179_v2 = vpop.eup %2178 }
 0x3e4   : > { %v1943_v3 = vadd.f32 1.0, %v2179_v2 }
 0x3e6   : > { %2180 = vrcp.f32 %v1943_v3 }
 0x3e7   : > { %2182 = vrcp.f32 %v1944_v24 }
 0x3f3   : > { %v2181_v29 = vpop.eup %2180 }
 0x3f4   : > { %v2183_v59 = vpop.eup %2182  ;;  %1950 = vst.msk [vmem:[%s487_s26] sm:$0xff] %vm1949_vm5, %v2181_v29 }
 0x3f5   : > { %1951 = vst.msk [vmem:[%s487_s26 + $0x8] sm:$0xff] %vm1949_vm5, %v2183_v59 }
 0x3f6 PF: > { %s26_s27 = sadd.s32 1, %s2220_s27  }
 0x3f7   : > { %p23_p1 = scmp.ge.s32.totalorder %s26_s27, 4  }
 0x3f9   :  { %25 = sbr.rel (!%p23_p1) target bundleno = 4 (0x4), region = 110 }
 0x3fe   :  { %1974 = vsyncpa [#allocation4], 1 }
 0x3ff   :  { %1976 = vsyncpa [#allocation4 + $0x1], 1 }

</bundles_post_ra>
